<compile_context>
chip_gen: v5e
topology: v5e:2x2
jax: 0.10.0
libtpu: 0.0.40
codegen_flags: <defaults>
</compile_context>

<pallas_src>
import functools

import jax
import jax.numpy as jnp
from jax.experimental import pallas as pl
from jax.experimental.pallas import tpu as pltpu


# ----------------------------------------------------------------------------
# Kernel helpers
# ----------------------------------------------------------------------------
def _layer_norm(x, g, b, eps=1e-5):
    mu = jnp.mean(x, axis=-1, keepdims=True)
    var = jnp.mean(jnp.square(x - mu), axis=-1, keepdims=True)
    return (x - mu) * jax.lax.rsqrt(var + eps) * g + b


# ----------------------------------------------------------------------------
# Kernel
# ----------------------------------------------------------------------------
def fused_encoder_kernel(x_hbm_ref,
                         wqkv_ref, bqkv_ref, wo_ref, bo_ref, g1_ref, be1_ref,
                         w1_ref, b1_ref, w2_ref, b2_ref, g2_ref, be2_ref,
                         wh1_ref, bh1_ref, wh2_ref, bh2_ref,
                         o_ref,
                         act_ref, copy_sem,
                         *, batch_tile, seq, num_heads, dim_k, compute_dtype):
    """One grid step = one TransformerEncoderLayer on one resident batch tile.

    Grid = (batch_tiles, num_layers).  act_ref (VMEM, f32) carries the
    activation of the current batch tile across the layer axis; x stays in
    HBM and is DMA'd into act_ref only at layer 0.  The classification head
    runs on the last layer step.
    """
    bt = pl.program_id(0)
    layer = pl.program_id(1)
    rows = batch_tile * seq
    d_model = num_heads * dim_k
    cdt = compute_dtype

    # Layer 0 of each batch tile: pull this tile's rows of x from HBM into the
    # resident activation scratch (x is never held/double-buffered in VMEM).
    @pl.when(layer == 0)
    def _():
        start = pl.multiple_of(bt * rows, rows)
        cp = pltpu.make_async_copy(x_hbm_ref.at[pl.ds(start, rows), :],
                                   act_ref, copy_sem.at[0])
        cp.start()
        cp.wait()

    x = act_ref[...]                                             # (rows, D) f32

    # Fused QKV projection: one (rows, D) @ (D, 3D) matmul, bf16 in / f32 acc.
    qkv = jnp.dot(x.astype(cdt), wqkv_ref[0],
                  preferred_element_type=jnp.float32) + bqkv_ref[0]
    qkv = qkv.astype(cdt).reshape(batch_tile, seq, 3 * d_model)
    q = qkv[:, :, 0 * d_model:1 * d_model]
    k = qkv[:, :, 1 * d_model:2 * d_model]
    v = qkv[:, :, 2 * d_model:3 * d_model]

    inv_scale = 1.0 / (dim_k ** 0.5)
    wo = wo_ref[0]                                               # (D, D) cdt
    attn = jnp.zeros((rows, d_model), jnp.float32)
    # TODO(synk): fold the head loop into one (B,H,S,dk) batched einsum once
    #             Mosaic's multi-batch-dim dot_general path is verified; the
    #             static unroll is kept for lowering robustness.
    for h in range(num_heads):                                   # static unroll
        sl = slice(h * dim_k, (h + 1) * dim_k)
        s = jnp.einsum("bqd,bkd->bqk", q[:, :, sl], k[:, :, sl],
                       preferred_element_type=jnp.float32) * inv_scale
        s = s - jnp.max(s, axis=-1, keepdims=True)               # f32 softmax
        p = jnp.exp(s)
        p = p * pl.reciprocal(jnp.sum(p, axis=-1, keepdims=True), approx=True)
        hout = jnp.einsum("bqk,bkd->bqd", p.astype(cdt), v[:, :, sl],
                          preferred_element_type=jnp.float32)    # (B, S, dk)
        # Accumulate the output projection per head (== concat(heads) @ Wo):
        # no staging scratch, no masked lane-offset stores, no VMEM reload.
        attn = attn + jnp.dot(hout.reshape(rows, dim_k).astype(cdt), wo[sl, :],
                              preferred_element_type=jnp.float32)
    attn = attn + bo_ref[0]

    # Residual + LayerNorm (attention sublayer), f32.
    y = _layer_norm(x + attn, g1_ref[0], be1_ref[0])

    # Feed-forward: Linear -> ReLU -> (dropout=id) -> Linear, bf16 in / f32 acc.
    h1 = jnp.maximum(
        jnp.dot(y.astype(cdt), w1_ref[0],
                preferred_element_type=jnp.float32) + b1_ref[0], 0.0)
    ff = jnp.dot(h1.astype(cdt), w2_ref[0],
                 preferred_element_type=jnp.float32) + b2_ref[0]

    # Residual + LayerNorm (feed-forward sublayer); stays resident for next layer.
    out = _layer_norm(y + ff, g2_ref[0], be2_ref[0])
    act_ref[...] = out

    # Classification head fused into the final layer step of this batch tile.
    @pl.when(layer == pl.num_programs(1) - 1)
    def _():
        m = jnp.mean(out.reshape(batch_tile, seq, d_model), axis=1)   # (B, D) f32
        hh = jnp.maximum(
            jnp.dot(m.astype(cdt), wh1_ref[...],
                    preferred_element_type=jnp.float32) + bh1_ref[...], 0.0)
        logits = (jnp.dot(hh.astype(cdt), wh2_ref[...],
                          preferred_element_type=jnp.float32) + bh2_ref[...])
        o_ref[...] = jax.nn.sigmoid(logits)


# ----------------------------------------------------------------------------
# pallas_call wrapper
# ----------------------------------------------------------------------------
def transformer_encoder_forward(tgt, params, num_heads, *, batch_tile=None):
    # Embedding gather + positional encoding are glue (plain JAX).
    x = jnp.take(params["embed"], tgt, axis=0)                   # (B, S, D)
    # embed_dropout: identity in eval
    x = x + params["pe"]
    B, S, D = x.shape
    x2 = x.reshape(B * S, D).astype(jnp.float32)

    L = params["wqkv"].shape[0]
    F = params["w1"].shape[-1]
    DH = params["wh1"].shape[-1]
    DO = params["wh2"].shape[-1]
    assert D % num_heads == 0
    dim_k = D // num_heads
    cdt = params["wqkv"].dtype                                   # matmul operand dtype

    if batch_tile is None:
        batch_tile = B
    assert B % batch_tile == 0
    assert batch_tile == B or batch_tile % 8 == 0, \
        "partial batch tiles must be sublane aligned"
    n_bt = B // batch_tile
    rows = batch_tile * S

    def lspec(shape):   # per-layer stacked weight: step over the layer axis
        n = len(shape)
        return pl.BlockSpec((1,) + shape, lambda b, l, n=n: (l,) + (0,) * n)

    def cspec(shape):   # grid-invariant (fetched once)
        n = len(shape)
        return pl.BlockSpec(shape, lambda b, l, n=n: (0,) * n)

    in_specs = [
        pl.BlockSpec(memory_space=pl.ANY),          # x stays in HBM; DMA at layer 0
        lspec((D, 3 * D)), lspec((1, 3 * D)),       # wqkv, bqkv
        lspec((D, D)),     lspec((1, D)),           # wo, bo
        lspec((1, D)),     lspec((1, D)),           # g1, be1
        lspec((D, F)),     lspec((1, F)),           # w1, b1
        lspec((F, D)),     lspec((1, D)),           # w2, b2
        lspec((1, D)),     lspec((1, D)),           # g2, be2
        cspec((D, DH)),    cspec((1, DH)),          # wh1, bh1
        cspec((DH, DO)),   cspec((1, DO)),          # wh2, bh2
    ]
    args = [x2,
            params["wqkv"], params["bqkv"], params["wo"], params["bo"],
            params["g1"], params["be1"], params["w1"], params["b1"],
            params["w2"], params["b2"], params["g2"], params["be2"],
            params["wh1"], params["bh1"], params["wh2"], params["bh2"]]

    kernel = functools.partial(fused_encoder_kernel, batch_tile=batch_tile,
                               seq=S, num_heads=num_heads, dim_k=dim_k,
                               compute_dtype=cdt)

    # Explicit scoped-VMEM budget: activation temporaries (f32) + one layer's
    # weight set double-buffered (weight dtype) + head weights + headroom.
    wbytes = jnp.dtype(cdt).itemsize
    acts = 4 * rows * (3 * D + 3 * D + F)
    layer_w = wbytes * (3 * D * D + D * D + 2 * D * F) + 4 * (3 * D + 6 * D + F)
    head_w = wbytes * (D * DH + DH * DO) + 4 * (DH + DO)
    est = int(1.25 * (acts + 2 * layer_w + head_w)) + (4 << 20)
    vmem_limit = max(32 << 20, min(est, 64 << 20))   # cap at v7x physical VMEM

    return pl.pallas_call(
        kernel,
        out_shape=jax.ShapeDtypeStruct((B, DO), jnp.float32),
        grid=(n_bt, L),
        in_specs=in_specs,
        out_specs=pl.BlockSpec((batch_tile, DO), lambda b, l: (b, 0)),
        scratch_shapes=[pltpu.VMEM((rows, D), jnp.float32),   # resident activation
                        pltpu.SemaphoreType.DMA((1,))],       # x -> act DMA sem
        compiler_params=pltpu.CompilerParams(
            dimension_semantics=("parallel", "arbitrary"),    # tiles || , layers seq
            vmem_limit_bytes=vmem_limit),
    )(*args)


# ----------------------------------------------------------------------------
# Parameters / glue (plain JAX)
# ----------------------------------------------------------------------------
def position_encoding(max_seq_len, dim_model):
    pos = jnp.arange(max_seq_len, dtype=jnp.float32).reshape(1, -1, 1)
    dim = jnp.arange(dim_model, dtype=jnp.float32).reshape(1, 1, -1)
    phase = pos / jnp.power(10000.0, dim / dim_model)
    return jnp.where(dim.astype(jnp.int32) % 2 == 0, jnp.sin(phase), jnp.cos(phase))


def init_params(key, *, vocab_size, max_len, num_layers, dim_model,
                dim_feedforward, dim_head, dim_out, weight_dtype=jnp.bfloat16):
    D, F, DH, L = dim_model, dim_feedforward, dim_head, num_layers
    f32 = jnp.float32
    scale = 0.05
    counter = [0]

    def nrm(shape, dtype):
        counter[0] += 1
        k = jax.random.fold_in(key, counter[0])
        return (scale * jax.random.normal(k, shape)).astype(dtype)

    def stack(shape):
        return jnp.stack([nrm(shape, weight_dtype) for _ in range(L)])

    return {
        "embed": nrm((vocab_size, D), f32),
        "pe": position_encoding(max_len, D),
        # Fused QKV weight, (in_features, out_features): columns ordered
        # [Q_h0..Q_h(H-1) | K_h0.. | V_h0..]; head h of Q/K/V occupies columns
        # h*dim_k:(h+1)*dim_k of its D-wide section.  (Importing real PyTorch
        # per-head nn.Linear weights requires a transpose + this packing.)
        "wqkv": stack((D, 3 * D)),
        "bqkv": jnp.zeros((L, 1, 3 * D), f32),
        "wo": stack((D, D)),   "bo": jnp.zeros((L, 1, D), f32),
        "g1": jnp.ones((L, 1, D), f32),  "be1": jnp.zeros((L, 1, D), f32),
        "w1": stack((D, F)),   "b1": jnp.zeros((L, 1, F), f32),
        "w2": stack((F, D)),   "b2": jnp.zeros((L, 1, D), f32),
        "g2": jnp.ones((L, 1, D), f32),  "be2": jnp.zeros((L, 1, D), f32),
        "wh1": nrm((D, DH), weight_dtype),       "bh1": jnp.zeros((1, DH), f32),
        "wh2": nrm((DH, dim_out), weight_dtype), "bh2": jnp.zeros((1, dim_out), f32),
    }


# ----------------------------------------------------------------------------
# main
# ----------------------------------------------------------------------------
if __name__ == "__main__":
    VOCAB = 64
    B, S = 2, 8          # batch, max_len (sequence length)
    D = 32               # dim_model
    NUM_HEADS = 4        # dim_k = 8
    F = 64               # dim_feedforward
    DH = 32              # dim_head
    NUM_LAYERS = 2
    DIM_OUT = 1

    key = jax.random.PRNGKey(0)
    pkey, dkey = jax.random.split(key)
    params = init_params(pkey, vocab_size=VOCAB, max_len=S,
                         num_layers=NUM_LAYERS, dim_model=D,
                         dim_feedforward=F, dim_head=DH, dim_out=DIM_OUT)

    tgt = jax.random.randint(dkey, (B, S), 0, VOCAB, dtype=jnp.int32)

    out = transformer_encoder_forward(tgt, params, NUM_HEADS)
    out = jax.block_until_ready(out)
    assert out.shape == (B, DIM_OUT)
    assert bool(jnp.all(jnp.isfinite(out)))
    print("KERNEL_OK")
</pallas_src>

<mosaic_0001>
module attributes {stable_mosaic.version = 11 : i64} {
  func.func @fused_encoder_kernel(%arg0: i32, %arg1: i32, %arg2: memref<16x32xf32, #tpu.memory_space<any>>, %arg3: memref<1x32x96xbf16, #tpu.memory_space<vmem>>, %arg4: memref<1x1x96xf32, #tpu.memory_space<vmem>>, %arg5: memref<1x32x32xbf16, #tpu.memory_space<vmem>>, %arg6: memref<1x1x32xf32, #tpu.memory_space<vmem>>, %arg7: memref<1x1x32xf32, #tpu.memory_space<vmem>>, %arg8: memref<1x1x32xf32, #tpu.memory_space<vmem>>, %arg9: memref<1x32x64xbf16, #tpu.memory_space<vmem>>, %arg10: memref<1x1x64xf32, #tpu.memory_space<vmem>>, %arg11: memref<1x64x32xbf16, #tpu.memory_space<vmem>>, %arg12: memref<1x1x32xf32, #tpu.memory_space<vmem>>, %arg13: memref<1x1x32xf32, #tpu.memory_space<vmem>>, %arg14: memref<1x1x32xf32, #tpu.memory_space<vmem>>, %arg15: memref<32x32xbf16, #tpu.memory_space<vmem>>, %arg16: memref<1x32xf32, #tpu.memory_space<vmem>>, %arg17: memref<32x1xbf16, #tpu.memory_space<vmem>>, %arg18: memref<1x1xf32, #tpu.memory_space<vmem>>, %arg19: memref<2x1xf32, #tpu.memory_space<vmem>>, %arg20: memref<16x32xf32, #tpu.memory_space<vmem>>, %arg21: memref<1x!tpu.dma_semaphore, #tpu.memory_space<semaphore_mem>>) attributes {dimension_semantics = [#tpu.dimension_semantics<parallel>, #tpu.dimension_semantics<arbitrary>], iteration_bounds = array<i64: 1, 2>, scalar_prefetch = 0 : i64, scratch_operands = 2 : i64, tpu.core_type = #tpu.core_type<tc>, window_params = [{}, {transform_indices = @transform_1, window_bounds = array<i64: 1, 32, 96>}, {transform_indices = @transform_2, window_bounds = array<i64: 1, 1, 96>}, {transform_indices = @transform_3, window_bounds = array<i64: 1, 32, 32>}, {transform_indices = @transform_4, window_bounds = array<i64: 1, 1, 32>}, {transform_indices = @transform_5, window_bounds = array<i64: 1, 1, 32>}, {transform_indices = @transform_6, window_bounds = array<i64: 1, 1, 32>}, {transform_indices = @transform_7, window_bounds = array<i64: 1, 32, 64>}, {transform_indices = @transform_8, window_bounds = array<i64: 1, 1, 64>}, {transform_indices = @transform_9, window_bounds = array<i64: 1, 64, 32>}, {transform_indices = @transform_10, window_bounds = array<i64: 1, 1, 32>}, {transform_indices = @transform_11, window_bounds = array<i64: 1, 1, 32>}, {transform_indices = @transform_12, window_bounds = array<i64: 1, 1, 32>}, {pipeline_mode = #tpu.pipeline_mode<synchronous>, transform_indices = @transform_13, window_bounds = array<i64: 32, 32>}, {pipeline_mode = #tpu.pipeline_mode<synchronous>, transform_indices = @transform_14, window_bounds = array<i64: 1, 32>}, {pipeline_mode = #tpu.pipeline_mode<synchronous>, transform_indices = @transform_15, window_bounds = array<i64: 32, 1>}, {pipeline_mode = #tpu.pipeline_mode<synchronous>, transform_indices = @transform_16, window_bounds = array<i64: 1, 1>}, {transform_indices = @transform_17, window_bounds = array<i64: 2, 1>}]} {
    %c0_i32 = arith.constant 0 : i32
    %0 = arith.cmpi eq, %arg1, %c0_i32 : i32
    %1 = arith.extui %0 : i1 to i32
    %c0_i32_0 = arith.constant 0 : i32
    %2 = arith.cmpi ne, %1, %c0_i32_0 : i32
    scf.if %2 {
      %c16_i32 = arith.constant 16 : i32
      %192 = arith.muli %arg0, %c16_i32 : i32
      %193 = tpu.assume_multiple %192, 16 : i32
      %c0_i32_79 = arith.constant 0 : i32
      %c0_i32_80 = arith.constant 0 : i32
      %194 = tpu.memref_slice %arg2[%193, %c0_i32_80] : memref<16x32xf32, #tpu.memory_space<any>> -> memref<16x32xf32, #tpu.memory_space<any>>
      %195 = tpu.memref_slice %arg21[%c0_i32_79] : memref<1x!tpu.dma_semaphore, #tpu.memory_space<semaphore_mem>> -> memref<1x!tpu.dma_semaphore, #tpu.memory_space<semaphore_mem>>
      %196 = tpu.memref_squeeze %195 : memref<1x!tpu.dma_semaphore, #tpu.memory_space<semaphore_mem>> -> memref<!tpu.dma_semaphore, #tpu.memory_space<semaphore_mem>>
      tpu.enqueue_dma source(%194 : memref<16x32xf32, #tpu.memory_space<any>>) target(%arg20 : memref<16x32xf32, #tpu.memory_space<vmem>>) target_semaphore(%196 : memref<!tpu.dma_semaphore, #tpu.memory_space<semaphore_mem>>)
      %c0_i32_81 = arith.constant 0 : i32
      %c0_i32_82 = arith.constant 0 : i32
      %197 = tpu.memref_slice %arg2[%193, %c0_i32_82] : memref<16x32xf32, #tpu.memory_space<any>> -> memref<16x32xf32, #tpu.memory_space<any>>
      %198 = tpu.memref_slice %arg21[%c0_i32_81] : memref<1x!tpu.dma_semaphore, #tpu.memory_space<semaphore_mem>> -> memref<1x!tpu.dma_semaphore, #tpu.memory_space<semaphore_mem>>
      %199 = tpu.memref_squeeze %198 : memref<1x!tpu.dma_semaphore, #tpu.memory_space<semaphore_mem>> -> memref<!tpu.dma_semaphore, #tpu.memory_space<semaphore_mem>>
      tpu.wait_dma2 semaphore(%199 : memref<!tpu.dma_semaphore, #tpu.memory_space<semaphore_mem>>) src(%197 : memref<16x32xf32, #tpu.memory_space<any>>) dst(%arg20 : memref<16x32xf32, #tpu.memory_space<vmem>>)
    } else {
    }
    %c0 = arith.constant 0 : index
    %c0_1 = arith.constant 0 : index
    %3 = vector.load %arg20[%c0, %c0_1] : memref<16x32xf32, #tpu.memory_space<vmem>>, vector<16x32xf32>
    %4 = arith.truncf %3 : vector<16x32xf32> to vector<16x32xbf16>
    %c0_2 = arith.constant 0 : index
    %c0_3 = arith.constant 0 : index
    %c0_4 = arith.constant 0 : index
    %5 = vector.load %arg3[%c0_2, %c0_3, %c0_4] : memref<1x32x96xbf16, #tpu.memory_space<vmem>>, vector<1x32x96xbf16>
    %6 = vector.shape_cast %5 : vector<1x32x96xbf16> to vector<32x96xbf16>
    %cst = arith.constant dense<0.000000e+00> : vector<16x96xf32>
    %7 = tpu.matmul %4, %6, %cst {dimension_numbers = #tpu.dot_dimension_numbers<[1], [0], [0], [1], [0, 0, 1, 1], [], []>} : vector<16x32xbf16>, vector<32x96xbf16>, vector<16x96xf32> -> vector<16x96xf32>
    %c0_5 = arith.constant 0 : index
    %c0_6 = arith.constant 0 : index
    %c0_7 = arith.constant 0 : index
    %8 = vector.load %arg4[%c0_5, %c0_6, %c0_7] : memref<1x1x96xf32, #tpu.memory_space<vmem>>, vector<1x1x96xf32>
    %9 = vector.shape_cast %8 : vector<1x1x96xf32> to vector<1x96xf32>
    %10 = vector.broadcast %9 : vector<1x96xf32> to vector<16x96xf32>
    %11 = arith.addf %7, %10 : vector<16x96xf32>
    %12 = arith.truncf %11 : vector<16x96xf32> to vector<16x96xbf16>
    %13 = vector.shape_cast %12 : vector<16x96xbf16> to vector<2x8x96xbf16>
    %14 = vector.extract_strided_slice %13 {offsets = [0, 0, 0], sizes = [2, 8, 32], strides = [1, 1, 1]} : vector<2x8x96xbf16> to vector<2x8x32xbf16>
    %15 = vector.extract_strided_slice %13 {offsets = [0, 0, 32], sizes = [2, 8, 32], strides = [1, 1, 1]} : vector<2x8x96xbf16> to vector<2x8x32xbf16>
    %16 = vector.extract_strided_slice %13 {offsets = [0, 0, 64], sizes = [2, 8, 32], strides = [1, 1, 1]} : vector<2x8x96xbf16> to vector<2x8x32xbf16>
    %c0_8 = arith.constant 0 : index
    %c0_9 = arith.constant 0 : index
    %c0_10 = arith.constant 0 : index
    %17 = vector.load %arg5[%c0_8, %c0_9, %c0_10] : memref<1x32x32xbf16, #tpu.memory_space<vmem>>, vector<1x32x32xbf16>
    %18 = vector.shape_cast %17 : vector<1x32x32xbf16> to vector<32x32xbf16>
    %cst_11 = arith.constant 0.000000e+00 : f32
    %19 = vector.broadcast %cst_11 : f32 to vector<16x32xf32>
    %20 = vector.extract_strided_slice %14 {offsets = [0, 0, 0], sizes = [2, 8, 8], strides = [1, 1, 1]} : vector<2x8x32xbf16> to vector<2x8x8xbf16>
    %21 = vector.extract_strided_slice %15 {offsets = [0, 0, 0], sizes = [2, 8, 8], strides = [1, 1, 1]} : vector<2x8x32xbf16> to vector<2x8x8xbf16>
    "tpu.trace_start"() <{level = 10 : i32, message = "bqd,bkd->bqk"}> : () -> ()
    %cst_12 = arith.constant dense<0.000000e+00> : vector<2x8x8xf32>
    %22 = tpu.matmul %20, %21, %cst_12 {dimension_numbers = #tpu.dot_dimension_numbers<[2], [2], [1], [1], [0, 0, 0, 1, 1, 1], [0], [0]>} : vector<2x8x8xbf16>, vector<2x8x8xbf16>, vector<2x8x8xf32> -> vector<2x8x8xf32>
    "tpu.trace_stop"() : () -> ()
    %cst_13 = arith.constant 0.353553385 : f32
    %23 = vector.broadcast %cst_13 : f32 to vector<2x8x8xf32>
    %24 = arith.mulf %22, %23 : vector<2x8x8xf32>
    %cst_14 = arith.constant dense<0xFF800000> : vector<2x8xf32>
    %25 = vector.multi_reduction <maximumf>, %24, %cst_14 [2] : vector<2x8x8xf32> to vector<2x8xf32>
    %26 = vector.shape_cast %25 : vector<2x8xf32> to vector<2x8x1xf32>
    %27 = vector.broadcast %26 : vector<2x8x1xf32> to vector<2x8x8xf32>
    %28 = arith.subf %24, %27 : vector<2x8x8xf32>
    %29 = math.exp %28 : vector<2x8x8xf32>
    %cst_15 = arith.constant dense<0.000000e+00> : vector<2x8xf32>
    %30 = vector.multi_reduction <add>, %29, %cst_15 [2] : vector<2x8x8xf32> to vector<2x8xf32>
    %31 = vector.shape_cast %30 : vector<2x8xf32> to vector<2x8x1xf32>
    %32 = tpu.reciprocal %31 {approx = true} : vector<2x8x1xf32> -> vector<2x8x1xf32>
    %33 = vector.broadcast %32 : vector<2x8x1xf32> to vector<2x8x8xf32>
    %34 = arith.mulf %29, %33 : vector<2x8x8xf32>
    %35 = arith.truncf %34 : vector<2x8x8xf32> to vector<2x8x8xbf16>
    %36 = vector.extract_strided_slice %16 {offsets = [0, 0, 0], sizes = [2, 8, 8], strides = [1, 1, 1]} : vector<2x8x32xbf16> to vector<2x8x8xbf16>
    "tpu.trace_start"() <{level = 10 : i32, message = "bqk,bkd->bqd"}> : () -> ()
    %cst_16 = arith.constant dense<0.000000e+00> : vector<2x8x8xf32>
    %37 = tpu.matmul %35, %36, %cst_16 {dimension_numbers = #tpu.dot_dimension_numbers<[2], [1], [1], [2], [0, 0, 0, 1, 1, 2], [0], [0]>} : vector<2x8x8xbf16>, vector<2x8x8xbf16>, vector<2x8x8xf32> -> vector<2x8x8xf32>
    "tpu.trace_stop"() : () -> ()
    %38 = vector.shape_cast %37 : vector<2x8x8xf32> to vector<16x8xf32>
    %39 = arith.truncf %38 : vector<16x8xf32> to vector<16x8xbf16>
    %40 = vector.extract_strided_slice %18 {offsets = [0, 0], sizes = [8, 32], strides = [1, 1]} : vector<32x32xbf16> to vector<8x32xbf16>
    %cst_17 = arith.constant dense<0.000000e+00> : vector<16x32xf32>
    %41 = tpu.matmul %39, %40, %cst_17 {dimension_numbers = #tpu.dot_dimension_numbers<[1], [0], [0], [1], [0, 0, 1, 1], [], []>} : vector<16x8xbf16>, vector<8x32xbf16>, vector<16x32xf32> -> vector<16x32xf32>
    %42 = arith.addf %19, %41 : vector<16x32xf32>
    %43 = vector.extract_strided_slice %14 {offsets = [0, 0, 8], sizes = [2, 8, 8], strides = [1, 1, 1]} : vector<2x8x32xbf16> to vector<2x8x8xbf16>
    %44 = vector.extract_strided_slice %15 {offsets = [0, 0, 8], sizes = [2, 8, 8], strides = [1, 1, 1]} : vector<2x8x32xbf16> to vector<2x8x8xbf16>
    "tpu.trace_start"() <{level = 10 : i32, message = "bqd,bkd->bqk"}> : () -> ()
    %cst_18 = arith.constant dense<0.000000e+00> : vector<2x8x8xf32>
    %45 = tpu.matmul %43, %44, %cst_18 {dimension_numbers = #tpu.dot_dimension_numbers<[2], [2], [1], [1], [0, 0, 0, 1, 1, 1], [0], [0]>} : vector<2x8x8xbf16>, vector<2x8x8xbf16>, vector<2x8x8xf32> -> vector<2x8x8xf32>
    "tpu.trace_stop"() : () -> ()
    %cst_19 = arith.constant 0.353553385 : f32
    %46 = vector.broadcast %cst_19 : f32 to vector<2x8x8xf32>
    %47 = arith.mulf %45, %46 : vector<2x8x8xf32>
    %cst_20 = arith.constant dense<0xFF800000> : vector<2x8xf32>
    %48 = vector.multi_reduction <maximumf>, %47, %cst_20 [2] : vector<2x8x8xf32> to vector<2x8xf32>
    %49 = vector.shape_cast %48 : vector<2x8xf32> to vector<2x8x1xf32>
    %50 = vector.broadcast %49 : vector<2x8x1xf32> to vector<2x8x8xf32>
    %51 = arith.subf %47, %50 : vector<2x8x8xf32>
    %52 = math.exp %51 : vector<2x8x8xf32>
    %cst_21 = arith.constant dense<0.000000e+00> : vector<2x8xf32>
    %53 = vector.multi_reduction <add>, %52, %cst_21 [2] : vector<2x8x8xf32> to vector<2x8xf32>
    %54 = vector.shape_cast %53 : vector<2x8xf32> to vector<2x8x1xf32>
    %55 = tpu.reciprocal %54 {approx = true} : vector<2x8x1xf32> -> vector<2x8x1xf32>
    %56 = vector.broadcast %55 : vector<2x8x1xf32> to vector<2x8x8xf32>
    %57 = arith.mulf %52, %56 : vector<2x8x8xf32>
    %58 = arith.truncf %57 : vector<2x8x8xf32> to vector<2x8x8xbf16>
    %59 = vector.extract_strided_slice %16 {offsets = [0, 0, 8], sizes = [2, 8, 8], strides = [1, 1, 1]} : vector<2x8x32xbf16> to vector<2x8x8xbf16>
    "tpu.trace_start"() <{level = 10 : i32, message = "bqk,bkd->bqd"}> : () -> ()
    %cst_22 = arith.constant dense<0.000000e+00> : vector<2x8x8xf32>
    %60 = tpu.matmul %58, %59, %cst_22 {dimension_numbers = #tpu.dot_dimension_numbers<[2], [1], [1], [2], [0, 0, 0, 1, 1, 2], [0], [0]>} : vector<2x8x8xbf16>, vector<2x8x8xbf16>, vector<2x8x8xf32> -> vector<2x8x8xf32>
    "tpu.trace_stop"() : () -> ()
    %61 = vector.shape_cast %60 : vector<2x8x8xf32> to vector<16x8xf32>
    %62 = arith.truncf %61 : vector<16x8xf32> to vector<16x8xbf16>
    %63 = vector.extract_strided_slice %18 {offsets = [8, 0], sizes = [8, 32], strides = [1, 1]} : vector<32x32xbf16> to vector<8x32xbf16>
    %cst_23 = arith.constant dense<0.000000e+00> : vector<16x32xf32>
    %64 = tpu.matmul %62, %63, %cst_23 {dimension_numbers = #tpu.dot_dimension_numbers<[1], [0], [0], [1], [0, 0, 1, 1], [], []>} : vector<16x8xbf16>, vector<8x32xbf16>, vector<16x32xf32> -> vector<16x32xf32>
    %65 = arith.addf %42, %64 : vector<16x32xf32>
    %66 = vector.extract_strided_slice %14 {offsets = [0, 0, 16], sizes = [2, 8, 8], strides = [1, 1, 1]} : vector<2x8x32xbf16> to vector<2x8x8xbf16>
    %67 = vector.extract_strided_slice %15 {offsets = [0, 0, 16], sizes = [2, 8, 8], strides = [1, 1, 1]} : vector<2x8x32xbf16> to vector<2x8x8xbf16>
    "tpu.trace_start"() <{level = 10 : i32, message = "bqd,bkd->bqk"}> : () -> ()
    %cst_24 = arith.constant dense<0.000000e+00> : vector<2x8x8xf32>
    %68 = tpu.matmul %66, %67, %cst_24 {dimension_numbers = #tpu.dot_dimension_numbers<[2], [2], [1], [1], [0, 0, 0, 1, 1, 1], [0], [0]>} : vector<2x8x8xbf16>, vector<2x8x8xbf16>, vector<2x8x8xf32> -> vector<2x8x8xf32>
    "tpu.trace_stop"() : () -> ()
    %cst_25 = arith.constant 0.353553385 : f32
    %69 = vector.broadcast %cst_25 : f32 to vector<2x8x8xf32>
    %70 = arith.mulf %68, %69 : vector<2x8x8xf32>
    %cst_26 = arith.constant dense<0xFF800000> : vector<2x8xf32>
    %71 = vector.multi_reduction <maximumf>, %70, %cst_26 [2] : vector<2x8x8xf32> to vector<2x8xf32>
    %72 = vector.shape_cast %71 : vector<2x8xf32> to vector<2x8x1xf32>
    %73 = vector.broadcast %72 : vector<2x8x1xf32> to vector<2x8x8xf32>
    %74 = arith.subf %70, %73 : vector<2x8x8xf32>
    %75 = math.exp %74 : vector<2x8x8xf32>
    %cst_27 = arith.constant dense<0.000000e+00> : vector<2x8xf32>
    %76 = vector.multi_reduction <add>, %75, %cst_27 [2] : vector<2x8x8xf32> to vector<2x8xf32>
    %77 = vector.shape_cast %76 : vector<2x8xf32> to vector<2x8x1xf32>
    %78 = tpu.reciprocal %77 {approx = true} : vector<2x8x1xf32> -> vector<2x8x1xf32>
    %79 = vector.broadcast %78 : vector<2x8x1xf32> to vector<2x8x8xf32>
    %80 = arith.mulf %75, %79 : vector<2x8x8xf32>
    %81 = arith.truncf %80 : vector<2x8x8xf32> to vector<2x8x8xbf16>
    %82 = vector.extract_strided_slice %16 {offsets = [0, 0, 16], sizes = [2, 8, 8], strides = [1, 1, 1]} : vector<2x8x32xbf16> to vector<2x8x8xbf16>
    "tpu.trace_start"() <{level = 10 : i32, message = "bqk,bkd->bqd"}> : () -> ()
    %cst_28 = arith.constant dense<0.000000e+00> : vector<2x8x8xf32>
    %83 = tpu.matmul %81, %82, %cst_28 {dimension_numbers = #tpu.dot_dimension_numbers<[2], [1], [1], [2], [0, 0, 0, 1, 1, 2], [0], [0]>} : vector<2x8x8xbf16>, vector<2x8x8xbf16>, vector<2x8x8xf32> -> vector<2x8x8xf32>
    "tpu.trace_stop"() : () -> ()
    %84 = vector.shape_cast %83 : vector<2x8x8xf32> to vector<16x8xf32>
    %85 = arith.truncf %84 : vector<16x8xf32> to vector<16x8xbf16>
    %86 = vector.extract_strided_slice %18 {offsets = [16, 0], sizes = [8, 32], strides = [1, 1]} : vector<32x32xbf16> to vector<8x32xbf16>
    %cst_29 = arith.constant dense<0.000000e+00> : vector<16x32xf32>
    %87 = tpu.matmul %85, %86, %cst_29 {dimension_numbers = #tpu.dot_dimension_numbers<[1], [0], [0], [1], [0, 0, 1, 1], [], []>} : vector<16x8xbf16>, vector<8x32xbf16>, vector<16x32xf32> -> vector<16x32xf32>
    %88 = arith.addf %65, %87 : vector<16x32xf32>
    %89 = vector.extract_strided_slice %14 {offsets = [0, 0, 24], sizes = [2, 8, 8], strides = [1, 1, 1]} : vector<2x8x32xbf16> to vector<2x8x8xbf16>
    %90 = vector.extract_strided_slice %15 {offsets = [0, 0, 24], sizes = [2, 8, 8], strides = [1, 1, 1]} : vector<2x8x32xbf16> to vector<2x8x8xbf16>
    "tpu.trace_start"() <{level = 10 : i32, message = "bqd,bkd->bqk"}> : () -> ()
    %cst_30 = arith.constant dense<0.000000e+00> : vector<2x8x8xf32>
    %91 = tpu.matmul %89, %90, %cst_30 {dimension_numbers = #tpu.dot_dimension_numbers<[2], [2], [1], [1], [0, 0, 0, 1, 1, 1], [0], [0]>} : vector<2x8x8xbf16>, vector<2x8x8xbf16>, vector<2x8x8xf32> -> vector<2x8x8xf32>
    "tpu.trace_stop"() : () -> ()
    %cst_31 = arith.constant 0.353553385 : f32
    %92 = vector.broadcast %cst_31 : f32 to vector<2x8x8xf32>
    %93 = arith.mulf %91, %92 : vector<2x8x8xf32>
    %cst_32 = arith.constant dense<0xFF800000> : vector<2x8xf32>
    %94 = vector.multi_reduction <maximumf>, %93, %cst_32 [2] : vector<2x8x8xf32> to vector<2x8xf32>
    %95 = vector.shape_cast %94 : vector<2x8xf32> to vector<2x8x1xf32>
    %96 = vector.broadcast %95 : vector<2x8x1xf32> to vector<2x8x8xf32>
    %97 = arith.subf %93, %96 : vector<2x8x8xf32>
    %98 = math.exp %97 : vector<2x8x8xf32>
    %cst_33 = arith.constant dense<0.000000e+00> : vector<2x8xf32>
    %99 = vector.multi_reduction <add>, %98, %cst_33 [2] : vector<2x8x8xf32> to vector<2x8xf32>
    %100 = vector.shape_cast %99 : vector<2x8xf32> to vector<2x8x1xf32>
    %101 = tpu.reciprocal %100 {approx = true} : vector<2x8x1xf32> -> vector<2x8x1xf32>
    %102 = vector.broadcast %101 : vector<2x8x1xf32> to vector<2x8x8xf32>
    %103 = arith.mulf %98, %102 : vector<2x8x8xf32>
    %104 = arith.truncf %103 : vector<2x8x8xf32> to vector<2x8x8xbf16>
    %105 = vector.extract_strided_slice %16 {offsets = [0, 0, 24], sizes = [2, 8, 8], strides = [1, 1, 1]} : vector<2x8x32xbf16> to vector<2x8x8xbf16>
    "tpu.trace_start"() <{level = 10 : i32, message = "bqk,bkd->bqd"}> : () -> ()
    %cst_34 = arith.constant dense<0.000000e+00> : vector<2x8x8xf32>
    %106 = tpu.matmul %104, %105, %cst_34 {dimension_numbers = #tpu.dot_dimension_numbers<[2], [1], [1], [2], [0, 0, 0, 1, 1, 2], [0], [0]>} : vector<2x8x8xbf16>, vector<2x8x8xbf16>, vector<2x8x8xf32> -> vector<2x8x8xf32>
    "tpu.trace_stop"() : () -> ()
    %107 = vector.shape_cast %106 : vector<2x8x8xf32> to vector<16x8xf32>
    %108 = arith.truncf %107 : vector<16x8xf32> to vector<16x8xbf16>
    %109 = vector.extract_strided_slice %18 {offsets = [24, 0], sizes = [8, 32], strides = [1, 1]} : vector<32x32xbf16> to vector<8x32xbf16>
    %cst_35 = arith.constant dense<0.000000e+00> : vector<16x32xf32>
    %110 = tpu.matmul %108, %109, %cst_35 {dimension_numbers = #tpu.dot_dimension_numbers<[1], [0], [0], [1], [0, 0, 1, 1], [], []>} : vector<16x8xbf16>, vector<8x32xbf16>, vector<16x32xf32> -> vector<16x32xf32>
    %111 = arith.addf %88, %110 : vector<16x32xf32>
    %c0_36 = arith.constant 0 : index
    %c0_37 = arith.constant 0 : index
    %c0_38 = arith.constant 0 : index
    %112 = vector.load %arg6[%c0_36, %c0_37, %c0_38] : memref<1x1x32xf32, #tpu.memory_space<vmem>>, vector<1x1x32xf32>
    %113 = vector.shape_cast %112 : vector<1x1x32xf32> to vector<1x32xf32>
    %114 = vector.broadcast %113 : vector<1x32xf32> to vector<16x32xf32>
    %115 = arith.addf %111, %114 : vector<16x32xf32>
    %116 = arith.addf %3, %115 : vector<16x32xf32>
    %c0_39 = arith.constant 0 : index
    %c0_40 = arith.constant 0 : index
    %c0_41 = arith.constant 0 : index
    %117 = vector.load %arg7[%c0_39, %c0_40, %c0_41] : memref<1x1x32xf32, #tpu.memory_space<vmem>>, vector<1x1x32xf32>
    %118 = vector.shape_cast %117 : vector<1x1x32xf32> to vector<1x32xf32>
    %c0_42 = arith.constant 0 : index
    %c0_43 = arith.constant 0 : index
    %c0_44 = arith.constant 0 : index
    %119 = vector.load %arg8[%c0_42, %c0_43, %c0_44] : memref<1x1x32xf32, #tpu.memory_space<vmem>>, vector<1x1x32xf32>
    %120 = vector.shape_cast %119 : vector<1x1x32xf32> to vector<1x32xf32>
    %cst_45 = arith.constant dense<0.000000e+00> : vector<16xf32>
    %121 = vector.multi_reduction <add>, %116, %cst_45 [1] : vector<16x32xf32> to vector<16xf32>
    %122 = vector.shape_cast %121 : vector<16xf32> to vector<16x1xf32>
    %cst_46 = arith.constant 3.200000e+01 : f32
    %123 = vector.broadcast %cst_46 : f32 to vector<16x1xf32>
    %124 = arith.divf %122, %123 : vector<16x1xf32>
    %125 = vector.broadcast %124 : vector<16x1xf32> to vector<16x32xf32>
    %126 = arith.subf %116, %125 : vector<16x32xf32>
    %127 = arith.mulf %126, %126 : vector<16x32xf32>
    %cst_47 = arith.constant dense<0.000000e+00> : vector<16xf32>
    %128 = vector.multi_reduction <add>, %127, %cst_47 [1] : vector<16x32xf32> to vector<16xf32>
    %129 = vector.shape_cast %128 : vector<16xf32> to vector<16x1xf32>
    %cst_48 = arith.constant 3.200000e+01 : f32
    %130 = vector.broadcast %cst_48 : f32 to vector<16x1xf32>
    %131 = arith.divf %129, %130 : vector<16x1xf32>
    %132 = vector.broadcast %124 : vector<16x1xf32> to vector<16x32xf32>
    %133 = arith.subf %116, %132 : vector<16x32xf32>
    %cst_49 = arith.constant 9.99999974E-6 : f32
    %134 = vector.broadcast %cst_49 : f32 to vector<16x1xf32>
    %135 = arith.addf %131, %134 : vector<16x1xf32>
    %136 = math.rsqrt %135 : vector<16x1xf32>
    %137 = vector.broadcast %136 : vector<16x1xf32> to vector<16x32xf32>
    %138 = arith.mulf %133, %137 : vector<16x32xf32>
    %139 = vector.broadcast %118 : vector<1x32xf32> to vector<16x32xf32>
    %140 = arith.mulf %138, %139 : vector<16x32xf32>
    %141 = vector.broadcast %120 : vector<1x32xf32> to vector<16x32xf32>
    %142 = arith.addf %140, %141 : vector<16x32xf32>
    %143 = arith.truncf %142 : vector<16x32xf32> to vector<16x32xbf16>
    %c0_50 = arith.constant 0 : index
    %c0_51 = arith.constant 0 : index
    %c0_52 = arith.constant 0 : index
    %144 = vector.load %arg9[%c0_50, %c0_51, %c0_52] : memref<1x32x64xbf16, #tpu.memory_space<vmem>>, vector<1x32x64xbf16>
    %145 = vector.shape_cast %144 : vector<1x32x64xbf16> to vector<32x64xbf16>
    %cst_53 = arith.constant dense<0.000000e+00> : vector<16x64xf32>
    %146 = tpu.matmul %143, %145, %cst_53 {dimension_numbers = #tpu.dot_dimension_numbers<[1], [0], [0], [1], [0, 0, 1, 1], [], []>} : vector<16x32xbf16>, vector<32x64xbf16>, vector<16x64xf32> -> vector<16x64xf32>
    %c0_54 = arith.constant 0 : index
    %c0_55 = arith.constant 0 : index
    %c0_56 = arith.constant 0 : index
    %147 = vector.load %arg10[%c0_54, %c0_55, %c0_56] : memref<1x1x64xf32, #tpu.memory_space<vmem>>, vector<1x1x64xf32>
    %148 = vector.shape_cast %147 : vector<1x1x64xf32> to vector<1x64xf32>
    %149 = vector.broadcast %148 : vector<1x64xf32> to vector<16x64xf32>
    %150 = arith.addf %146, %149 : vector<16x64xf32>
    %cst_57 = arith.constant 0.000000e+00 : f32
    %151 = vector.broadcast %cst_57 : f32 to vector<16x64xf32>
    %152 = arith.maximumf %150, %151 : vector<16x64xf32>
    %153 = arith.truncf %152 : vector<16x64xf32> to vector<16x64xbf16>
    %c0_58 = arith.constant 0 : index
    %c0_59 = arith.constant 0 : index
    %c0_60 = arith.constant 0 : index
    %154 = vector.load %arg11[%c0_58, %c0_59, %c0_60] : memref<1x64x32xbf16, #tpu.memory_space<vmem>>, vector<1x64x32xbf16>
    %155 = vector.shape_cast %154 : vector<1x64x32xbf16> to vector<64x32xbf16>
    %cst_61 = arith.constant dense<0.000000e+00> : vector<16x32xf32>
    %156 = tpu.matmul %153, %155, %cst_61 {dimension_numbers = #tpu.dot_dimension_numbers<[1], [0], [0], [1], [0, 0, 1, 1], [], []>} : vector<16x64xbf16>, vector<64x32xbf16>, vector<16x32xf32> -> vector<16x32xf32>
    %c0_62 = arith.constant 0 : index
    %c0_63 = arith.constant 0 : index
    %c0_64 = arith.constant 0 : index
    %157 = vector.load %arg12[%c0_62, %c0_63, %c0_64] : memref<1x1x32xf32, #tpu.memory_space<vmem>>, vector<1x1x32xf32>
    %158 = vector.shape_cast %157 : vector<1x1x32xf32> to vector<1x32xf32>
    %159 = vector.broadcast %158 : vector<1x32xf32> to vector<16x32xf32>
    %160 = arith.addf %156, %159 : vector<16x32xf32>
    %161 = arith.addf %142, %160 : vector<16x32xf32>
    %c0_65 = arith.constant 0 : index
    %c0_66 = arith.constant 0 : index
    %c0_67 = arith.constant 0 : index
    %162 = vector.load %arg13[%c0_65, %c0_66, %c0_67] : memref<1x1x32xf32, #tpu.memory_space<vmem>>, vector<1x1x32xf32>
    %163 = vector.shape_cast %162 : vector<1x1x32xf32> to vector<1x32xf32>
    %c0_68 = arith.constant 0 : index
    %c0_69 = arith.constant 0 : index
    %c0_70 = arith.constant 0 : index
    %164 = vector.load %arg14[%c0_68, %c0_69, %c0_70] : memref<1x1x32xf32, #tpu.memory_space<vmem>>, vector<1x1x32xf32>
    %165 = vector.shape_cast %164 : vector<1x1x32xf32> to vector<1x32xf32>
    %cst_71 = arith.constant dense<0.000000e+00> : vector<16xf32>
    %166 = vector.multi_reduction <add>, %161, %cst_71 [1] : vector<16x32xf32> to vector<16xf32>
    %167 = vector.shape_cast %166 : vector<16xf32> to vector<16x1xf32>
    %cst_72 = arith.constant 3.200000e+01 : f32
    %168 = vector.broadcast %cst_72 : f32 to vector<16x1xf32>
    %169 = arith.divf %167, %168 : vector<16x1xf32>
    %170 = vector.broadcast %169 : vector<16x1xf32> to vector<16x32xf32>
    %171 = arith.subf %161, %170 : vector<16x32xf32>
    %172 = arith.mulf %171, %171 : vector<16x32xf32>
    %cst_73 = arith.constant dense<0.000000e+00> : vector<16xf32>
    %173 = vector.multi_reduction <add>, %172, %cst_73 [1] : vector<16x32xf32> to vector<16xf32>
    %174 = vector.shape_cast %173 : vector<16xf32> to vector<16x1xf32>
    %cst_74 = arith.constant 3.200000e+01 : f32
    %175 = vector.broadcast %cst_74 : f32 to vector<16x1xf32>
    %176 = arith.divf %174, %175 : vector<16x1xf32>
    %177 = vector.broadcast %169 : vector<16x1xf32> to vector<16x32xf32>
    %178 = arith.subf %161, %177 : vector<16x32xf32>
    %cst_75 = arith.constant 9.99999974E-6 : f32
    %179 = vector.broadcast %cst_75 : f32 to vector<16x1xf32>
    %180 = arith.addf %176, %179 : vector<16x1xf32>
    %181 = math.rsqrt %180 : vector<16x1xf32>
    %182 = vector.broadcast %181 : vector<16x1xf32> to vector<16x32xf32>
    %183 = arith.mulf %178, %182 : vector<16x32xf32>
    %184 = vector.broadcast %163 : vector<1x32xf32> to vector<16x32xf32>
    %185 = arith.mulf %183, %184 : vector<16x32xf32>
    %186 = vector.broadcast %165 : vector<1x32xf32> to vector<16x32xf32>
    %187 = arith.addf %185, %186 : vector<16x32xf32>
    %c0_76 = arith.constant 0 : index
    %c0_77 = arith.constant 0 : index
    %188 = vector.load %arg20[%c0_76, %c0_77] : memref<16x32xf32, #tpu.memory_space<vmem>>, vector<16x32xf32>
    tpu.vector_store %arg20[%c0_76, %c0_77], %187 {strides = array<i32>} : memref<16x32xf32, #tpu.memory_space<vmem>>, vector<16x32xf32>,
    %c1_i32 = arith.constant 1 : i32
    %189 = arith.cmpi eq, %arg1, %c1_i32 : i32
    %190 = arith.extui %189 : i1 to i32
    %c0_i32_78 = arith.constant 0 : i32
    %191 = arith.cmpi ne, %190, %c0_i32_78 : i32
    scf.if %191 {
      %192 = vector.shape_cast %187 : vector<16x32xf32> to vector<2x8x32xf32>
      %cst_79 = arith.constant dense<0.000000e+00> : vector<2x32xf32>
      %193 = vector.multi_reduction <add>, %192, %cst_79 [1] : vector<2x8x32xf32> to vector<2x32xf32>
      %cst_80 = arith.constant 8.000000e+00 : f32
      %194 = vector.broadcast %cst_80 : f32 to vector<2x32xf32>
      %195 = arith.divf %193, %194 : vector<2x32xf32>
      %196 = arith.truncf %195 : vector<2x32xf32> to vector<2x32xbf16>
      %c0_81 = arith.constant 0 : index
      %c0_82 = arith.constant 0 : index
      %197 = vector.load %arg15[%c0_81, %c0_82] : memref<32x32xbf16, #tpu.memory_space<vmem>>, vector<32x32xbf16>
      %cst_83 = arith.constant dense<0.000000e+00> : vector<2x32xf32>
      %198 = tpu.matmul %196, %197, %cst_83 {dimension_numbers = #tpu.dot_dimension_numbers<[1], [0], [0], [1], [0, 0, 1, 1], [], []>} : vector<2x32xbf16>, vector<32x32xbf16>, vector<2x32xf32> -> vector<2x32xf32>
      %c0_84 = arith.constant 0 : index
      %c0_85 = arith.constant 0 : index
      %199 = vector.load %arg16[%c0_84, %c0_85] : memref<1x32xf32, #tpu.memory_space<vmem>>, vector<1x32xf32>
      %200 = vector.broadcast %199 : vector<1x32xf32> to vector<2x32xf32>
      %201 = arith.addf %198, %200 : vector<2x32xf32>
      %cst_86 = arith.constant 0.000000e+00 : f32
      %202 = vector.broadcast %cst_86 : f32 to vector<2x32xf32>
      %203 = arith.maximumf %201, %202 : vector<2x32xf32>
      %204 = arith.truncf %203 : vector<2x32xf32> to vector<2x32xbf16>
      %c0_87 = arith.constant 0 : index
      %c0_88 = arith.constant 0 : index
      %205 = vector.load %arg17[%c0_87, %c0_88] : memref<32x1xbf16, #tpu.memory_space<vmem>>, vector<32x1xbf16>
      %cst_89 = arith.constant dense<0.000000e+00> : vector<2x1xf32>
      %206 = tpu.matmul %204, %205, %cst_89 {dimension_numbers = #tpu.dot_dimension_numbers<[1], [0], [0], [1], [0, 0, 1, 1], [], []>} : vector<2x32xbf16>, vector<32x1xbf16>, vector<2x1xf32> -> vector<2x1xf32>
      %c0_90 = arith.constant 0 : index
      %c0_91 = arith.constant 0 : index
      %207 = vector.load %arg18[%c0_90, %c0_91] : memref<1x1xf32, #tpu.memory_space<vmem>>, vector<1x1xf32>
      %208 = vector.broadcast %207 : vector<1x1xf32> to vector<2x1xf32>
      %209 = arith.addf %206, %208 : vector<2x1xf32>
      %210 = arith.negf %209 : vector<2x1xf32>
      %211 = math.exp %210 : vector<2x1xf32>
      %cst_92 = arith.constant 1.000000e+00 : f32
      %212 = vector.broadcast %cst_92 : f32 to vector<2x1xf32>
      %213 = arith.addf %212, %211 : vector<2x1xf32>
      %214 = arith.divf %212, %213 : vector<2x1xf32>
      %c0_93 = arith.constant 0 : index
      %c0_94 = arith.constant 0 : index
      %215 = vector.load %arg19[%c0_93, %c0_94] : memref<2x1xf32, #tpu.memory_space<vmem>>, vector<2x1xf32>
      tpu.vector_store %arg19[%c0_93, %c0_94], %214 {strides = array<i32>} : memref<2x1xf32, #tpu.memory_space<vmem>>, vector<2x1xf32>,
    } else {
    }
    return
  }
  func.func @transform_1(%arg0: i32, %arg1: i32) -> (i32, i32, i32) {
    %c0_i32 = arith.constant 0 : i32
    %c0_i32_0 = arith.constant 0 : i32
    %c0_i32_1 = arith.constant 0 : i32
    return %arg1, %c0_i32, %c0_i32_0 : i32, i32, i32
  }
  func.func @transform_2(%arg0: i32, %arg1: i32) -> (i32, i32, i32) {
    %c0_i32 = arith.constant 0 : i32
    %c0_i32_0 = arith.constant 0 : i32
    %c0_i32_1 = arith.constant 0 : i32
    return %arg1, %c0_i32, %c0_i32_0 : i32, i32, i32
  }
  func.func @transform_3(%arg0: i32, %arg1: i32) -> (i32, i32, i32) {
    %c0_i32 = arith.constant 0 : i32
    %c0_i32_0 = arith.constant 0 : i32
    %c0_i32_1 = arith.constant 0 : i32
    return %arg1, %c0_i32, %c0_i32_0 : i32, i32, i32
  }
  func.func @transform_4(%arg0: i32, %arg1: i32) -> (i32, i32, i32) {
    %c0_i32 = arith.constant 0 : i32
    %c0_i32_0 = arith.constant 0 : i32
    %c0_i32_1 = arith.constant 0 : i32
    return %arg1, %c0_i32, %c0_i32_0 : i32, i32, i32
  }
  func.func @transform_5(%arg0: i32, %arg1: i32) -> (i32, i32, i32) {
    %c0_i32 = arith.constant 0 : i32
    %c0_i32_0 = arith.constant 0 : i32
    %c0_i32_1 = arith.constant 0 : i32
    return %arg1, %c0_i32, %c0_i32_0 : i32, i32, i32
  }
  func.func @transform_6(%arg0: i32, %arg1: i32) -> (i32, i32, i32) {
    %c0_i32 = arith.constant 0 : i32
    %c0_i32_0 = arith.constant 0 : i32
    %c0_i32_1 = arith.constant 0 : i32
    return %arg1, %c0_i32, %c0_i32_0 : i32, i32, i32
  }
  func.func @transform_7(%arg0: i32, %arg1: i32) -> (i32, i32, i32) {
    %c0_i32 = arith.constant 0 : i32
    %c0_i32_0 = arith.constant 0 : i32
    %c0_i32_1 = arith.constant 0 : i32
    return %arg1, %c0_i32, %c0_i32_0 : i32, i32, i32
  }
  func.func @transform_8(%arg0: i32, %arg1: i32) -> (i32, i32, i32) {
    %c0_i32 = arith.constant 0 : i32
    %c0_i32_0 = arith.constant 0 : i32
    %c0_i32_1 = arith.constant 0 : i32
    return %arg1, %c0_i32, %c0_i32_0 : i32, i32, i32
  }
  func.func @transform_9(%arg0: i32, %arg1: i32) -> (i32, i32, i32) {
    %c0_i32 = arith.constant 0 : i32
    %c0_i32_0 = arith.constant 0 : i32
    %c0_i32_1 = arith.constant 0 : i32
    return %arg1, %c0_i32, %c0_i32_0 : i32, i32, i32
  }
  func.func @transform_10(%arg0: i32, %arg1: i32) -> (i32, i32, i32) {
    %c0_i32 = arith.constant 0 : i32
    %c0_i32_0 = arith.constant 0 : i32
    %c0_i32_1 = arith.constant 0 : i32
    return %arg1, %c0_i32, %c0_i32_0 : i32, i32, i32
  }
  func.func @transform_11(%arg0: i32, %arg1: i32) -> (i32, i32, i32) {
    %c0_i32 = arith.constant 0 : i32
    %c0_i32_0 = arith.constant 0 : i32
    %c0_i32_1 = arith.constant 0 : i32
    return %arg1, %c0_i32, %c0_i32_0 : i32, i32, i32
  }
  func.func @transform_12(%arg0: i32, %arg1: i32) -> (i32, i32, i32) {
    %c0_i32 = arith.constant 0 : i32
    %c0_i32_0 = arith.constant 0 : i32
    %c0_i32_1 = arith.constant 0 : i32
    return %arg1, %c0_i32, %c0_i32_0 : i32, i32, i32
  }
  func.func @transform_13(%arg0: i32, %arg1: i32) -> (i32, i32) {
    %c0_i32 = arith.constant 0 : i32
    %c0_i32_0 = arith.constant 0 : i32
    %c0_i32_1 = arith.constant 0 : i32
    return %c0_i32, %c0_i32_0 : i32, i32
  }
  func.func @transform_14(%arg0: i32, %arg1: i32) -> (i32, i32) {
    %c0_i32 = arith.constant 0 : i32
    %c0_i32_0 = arith.constant 0 : i32
    %c0_i32_1 = arith.constant 0 : i32
    return %c0_i32, %c0_i32_0 : i32, i32
  }
  func.func @transform_15(%arg0: i32, %arg1: i32) -> (i32, i32) {
    %c0_i32 = arith.constant 0 : i32
    %c0_i32_0 = arith.constant 0 : i32
    %c0_i32_1 = arith.constant 0 : i32
    return %c0_i32, %c0_i32_0 : i32, i32
  }
  func.func @transform_16(%arg0: i32, %arg1: i32) -> (i32, i32) {
    %c0_i32 = arith.constant 0 : i32
    %c0_i32_0 = arith.constant 0 : i32
    %c0_i32_1 = arith.constant 0 : i32
    return %c0_i32, %c0_i32_0 : i32, i32
  }
  func.func @transform_17(%arg0: i32, %arg1: i32) -> (i32, i32) {
    %c0_i32 = arith.constant 0 : i32
    %c0_i32_0 = arith.constant 0 : i32
    return %arg0, %c0_i32 : i32, i32
  }
}

</mosaic_0001>

<bundles_post_ra>
// kernel: tpu_custom_call.1
= control target key start
LH: loop header
LB: loop body
LE: loop exit
PB: predicated region body
PF: predicated region fallthrough
CT: control target
= control target key end

     0   :  { %s2831_s0 = inlined_call_operand.vmem [shape: f32[16,32], index: 0, kind: input, shape index: {}]   ;;  %s2832_s1 = inlined_call_operand.vmem [shape: bf16[2,32,96], index: 1, kind: input, shape index: {}]   ;;  %s2833_s2 = inlined_call_operand.vmem [shape: f32[2,1,96], index: 2, kind: input, shape index: {}]   ;;  %s2834_s3 = inlined_call_operand.vmem [shape: bf16[2,32,32], index: 3, kind: input, shape index: {}]   ;;  %s2835_s4 = inlined_call_operand.vmem [shape: f32[2,1,32], index: 4, kind: input, shape index: {}]   ;;  %s2836_s5 = inlined_call_operand.hbm [shape: f32[2,1,32], index: 5, kind: input, shape index: {}]   ;;  %s2837_s6 = inlined_call_operand.vmem [shape: f32[2,1,32], index: 6, kind: input, shape index: {}]   ;;  %s2838_s7 = inlined_call_operand.vmem [shape: bf16[2,32,64], index: 7, kind: input, shape index: {}]   ;;  %s2839_s8 = inlined_call_operand.vmem [shape: f32[2,1,64], index: 8, kind: input, shape index: {}]   ;;  %s2840_s9 = inlined_call_operand.vmem [shape: bf16[2,64,32], index: 9, kind: input, shape index: {}]   ;;  %s2841_s10 = inlined_call_operand.vmem [shape: f32[2,1,32], index: 10, kind: input, shape index: {}]   ;;  %s2842_s11 = inlined_call_operand.hbm [shape: f32[2,1,32], index: 11, kind: input, shape index: {}]   ;;  %s2843_s12 = inlined_call_operand.vmem [shape: f32[2,1,32], index: 12, kind: input, shape index: {}]   ;;  %s2844_s13 = inlined_call_operand.hbm [shape: bf16[32,32], index: 13, kind: input, shape index: {}]   ;;  %s2845_s14 = inlined_call_operand.vmem [shape: f32[1,32], index: 14, kind: input, shape index: {}]   ;;  %s2846_s15 = inlined_call_operand.vmem [shape: bf16[32,1], index: 15, kind: input, shape index: {}]   ;;  %s2847_s16 = inlined_call_operand.<no memory space> [shape: f32[1,1], index: 16, kind: input, shape index: {}]   ;;  %s2848_s17 = inlined_call_operand.vmem [shape: f32[2,1], index: 17, kind: output, shape index: {}]  }
   0x1   :  { %2855 = sst [smem:[#allocation19_spill]] %s2831_s0  ;;  %v22_v0 = vstv %s2847_s16 }
   0x2   :  { %2856 = sst [smem:[#allocation20_spill]] %s2832_s1  ;;  %23 = vst [vmem:[#allocation4] sm:$0x1] %v22_v0 }
   0x3   :  { %2857 = sst [smem:[#allocation21_spill]] %s2833_s2 }
   0x4   :  { %2858 = sst [smem:[#allocation22_spill]] %s2834_s3 }
   0x5   :  { %2859 = sst [smem:[#allocation23_spill]] %s2836_s5 }
   0x6   :  { %2860 = sst [smem:[#allocation24_spill]] %s2838_s7 }
   0x7   :  { %2861 = sst [smem:[#allocation25_spill]] %s2839_s8 }
   0x8   :  { %2862 = sst [smem:[#allocation26_spill]] %s2840_s9 }
   0x9   :  { %2863 = sst [smem:[#allocation27_spill]] %s2841_s10 }
   0xa   :  { %2864 = sst [smem:[#allocation28_spill]] %s2842_s11 }
   0xb   :  { %2865 = sst [smem:[#allocation29_spill]] %s2843_s12 }
   0xc   :  { %2866 = sst [smem:[#allocation30_spill]] %s2844_s13 }
   0xd   :  { %2867 = sst [smem:[#allocation31_spill]] %s2845_s14 }
   0xe   :  { %2868 = sst [smem:[#allocation32_spill]] %s2846_s15 }
   0xf   :  { %2869 = sst [smem:[#allocation33_spill]] %s2848_s17 }
  0x10   :  { %24 = vsyncpa [#allocation6], 0 }
  0x11   :  { %26 = vsyncpa [#allocation6 + $0x1], 0 }
  0x12   :  { %27 = vsyncpa [#allocation8], 0 }
  0x13   :  { %29 = vsyncpa [#allocation8 + $0x1], 0  ;;  %s2470_s26 = smov 0   ;;  %s2472_s27 = smov 0  }
  0x14   :  { %s2474_s28 = smov 0   ;;  %s2476_s29 = smov 0  }
  0x15   :  { %s2478_s0 = smov 0   ;;  %s2480_s30 = smov 0  }
  0x16 LB: > { %2870 = sst [smem:[#allocation15_spill]] %s2347_s28  ;;  %s2850_s16 = sadd.s32 4294967295, %s2359_s30   ;;  %s2359_s30 = sphi %s2480_s30, %s35_s30   ;;  %s2355_s0 = sphi %s2478_s0, %s2904_s0   ;;  %s2351_s29 = sphi %s2476_s29, %s2903_s29   ;;  %s2347_s28 = sphi %s2474_s28, %s2902_s28   ;;  %s2343_s27 = sphi %s2472_s27, %s2906_s27   ;;  %s2339_s26 = sphi %s2470_s26, %s2905_s26  }
  0x17   : > { %2871 = sst [smem:[#allocation16_spill]] %s2355_s0  ;;  %p1956_p0 = scmp.ge.s32.totalorder %s2359_s30, 1 }
  0x18   : > { %p2504_p1 = scmp.eq.s32.totalorder %s2850_s16, 0  ;;  %p474_p2 = scmp.lt.s32.totalorder %s2359_s30, 3 }
  0x19   : > { %s2873_s13 = sld [smem:[#allocation30_spill]]  ;;  %s2361_s22 = smov [#allocation9]  }
  0x1a   : > { %p2512_p3 = pnand %p1956_p0, %p474_p2  ;;  %s487_s23 = sshll.u32 %s2361_s22, 4  ;;  %s488_s23 = int_to_ptr.vmem [resolvable:$true] %s487_s23 }
  0x1b   : > { %s2362_s24 = smov 64   ;;  %s2363_s25 = smov 4  }
  0x1c   : > { %p2073_p4 = pneg %p2512_p3  ;;  %s44_s19 = sadd.s32 1, %s2355_s0 }
  0x1d   : > { %p45_p6 = scmp.ge.s32.totalorder %s44_s19, 2  ;;  %s158_s1 = sadd.s32 1, %s2347_s28 }
  0x1e   : > { %p2074_p5 = pnand %p2073_p4, %p2504_p1  ;;  %p165_p7 = scmp.ne.s32.totalorder %s2347_s28, %s2343_s27 }
  0x1f   : > { %s485_s20 = sshll.u32 %s2873_s13, 4  ;;  %p166_p8 = scmp.eq.s32.totalorder %s2359_s30, 0  ;;  %s486_s20 = int_to_ptr.hbm [resolvable:$true] %s485_s20 }
  0x20   : > { %2076 = dma.hbm_to_vmem [thread:$0]  (!%p2074_p5), %s486_s20, 256, %s488_s23, [#allocation8], %s2362_s24, %s2362_s24, %s2363_s25  }
  0x21   : > { %s2908_s19 = smov (%p45_p6, %s44_s19), 0  ;;  %p2527_p9 = por %p166_p8, %p165_p7 }
  0x22   : > { %2875 = sst [smem:[#allocation17_spill]] %s2908_s19  ;;  %p171_p10 = scmp.ne.s32.totalorder %s2343_s27, %s2339_s26 }
  0x23   : > { %s155_s16 = ssub.s32 %s2355_s0, %s2908_s19  ;;  %p2085_p11 = scmp.lt.s32.totalorder %s2359_s30, 2 }
  0x24   : > { %p156_p12 = scmp.eq.s32.totalorder %s155_s16, 0  ;;  %p2538_p13 = por %p2504_p1, %p171_p10 }
  0x25   : > { %s538_s23 = sand.u32 1, %s2347_s28   ;;  %s2878_s5 = sld [smem:[#allocation23_spill]] }
  0x26   : > { %s2548_s17 = scalar_select %p156_p12, %s2347_s28, %s158_s1  }
  0x27   : > { %s541_s15 = scalar_lea.vmem [#allocation5], %s538_s23  ;;  %p2078_p0 = pnand %p2085_p11, %p2527_p9 }
  0x28   : > { %2879 = sst [smem:[#allocation18_spill]] %s2548_s17  ;;  %s548_s12 = sshll.u32 %s541_s15, 4  ;;  %s549_s12 = int_to_ptr.vmem [resolvable:$true] %s548_s12 }
  0x29   : > { %s589_s26 = sand.u32 1, %s2359_s30   ;;  %s2880_s11 = sld [smem:[#allocation28_spill]] }
  0x2a   : > { %s539_s10 = scalar_lea.sflag [#allocation6], %s538_s23  ;;  %s592_s7 = scalar_lea.vmem [#allocation7], %s538_s23 }
  0x2b   : > { %s544_s13 = scalar_lea.hbm %s2878_s5, %s2355_s0  ;;  %s599_s24 = sshll.u32 %s592_s7, 4  ;;  %s600_s24 = int_to_ptr.vmem [resolvable:$true] %s599_s24 }
  0x2c   : > { %s546_s14 = sshll.u32 %s544_s13, 4  ;;  %s590_s1 = scalar_lea.sflag [#allocation8], %s589_s26  ;;  %s547_s14 = int_to_ptr.hbm [resolvable:$true] %s546_s14 }
  0x2d   : > { %2080 = dma.hbm_to_vmem [thread:$0]  (!%p2078_p0), %s547_s14, 16, %s549_s12, %s539_s10  }
  0x2e   : > { %614 = sbr.rel (%p2512_p3) target bundleno = 2949 (0xb85), region = 84  ;;  %s2560_s13 = sand.u32 (!%p2512_p3), 1, %s2343_s27  }
  0x2f   : > { %s595_s9 = scalar_lea.hbm %s2880_s11, %s2355_s0  ;;  %s617_s15 = scalar_lea.sflag (!%p2512_p3), [#allocation6], %s2560_s13 }
  0x30   : > { %s597_s8 = sshll.u32 %s595_s9, 4  ;;  %s598_s8 = int_to_ptr.hbm [resolvable:$true] %s597_s8 }
  0x31   : > { %2083 = dma.hbm_to_vmem [thread:$0]  (!%p2078_p0), %s598_s8, 16, %s600_s24, %s590_s1  }
  0x33   : > { %2324 = dma.done.wait (%p2538_p13), %s617_s15, 16  }
  0x34   : > { %2326 = vsyncadd (%p2538_p13), %s617_s15, 4294967280  ;;  %s2881_s7 = sadd.s32 4294967295, %s2359_s30  }
  0x35   : > { %s625_s8 = sand.u32 1, %s2881_s7  }
  0x36   : > { %s626_s9 = scalar_lea.sflag [#allocation8], %s625_s8 }
  0x37   : > { %2328 = dma.done.wait (%p2538_p13), %s626_s9, 16  }
  0x38   : > { %2330 = vsyncadd (%p2538_p13), %s626_s9, 4294967280 }
  0x39   : > { %2332 = dma.done.wait (%p2504_p1), [#allocation8], 256  }
  0x3a   : > { %2334 = vsyncadd (%p2504_p1), [#allocation8], 4294967040  ;;  %p723_p2 = scmp.lt.s32.totalorder %s2351_s29, 1  ;;  %s2882_s2 = sld [smem:[#allocation21_spill]] }
  0x3b   : > { %s2883_s25 = sld [smem:[#allocation20_spill]]  ;;  %p1969_p1 = scmp.ne.s32.totalorder %s2351_s29, 0 }
  0x3c   : > { %s2581_s12 = scalar_select %p723_p2, %s2351_s29, 1 }
  0x3d   : > { %s2884_s3 = sld [smem:[#allocation22_spill]] }
  0x3e   : > { %s2049_s14 = sshll.u32 %s2581_s12, 4  ;;  %s2885_s22 = sld [smem:[#allocation24_spill]] }
  0x3f   : > { %s2052_s16 = sshll.u32 %s2581_s12, 5  ;;  %s2887_s0 = sld [smem:[#allocation27_spill]] }
  0x40   : > { %s730_s20 = scalar_lea.vmem %s2882_s2, %s2581_s12  ;;  %s2888_s8 = sld [smem:[#allocation26_spill]] }
  0x41   : > { %s727_s26 = scalar_lea.vmem %s2883_s25, %s2049_s14  ;;  %s2886_s25 = sld [smem:[#allocation25_spill]] }
  0x42   : > { %s2889_s19 = sld [smem:[#allocation29_spill]] }
  0x43   : > { %s2594_s1 = scalar_lea.vmem %s2884_s3, %s2049_s14 }
  0x44   : > { %s2607_s2 = scalar_lea.vmem %s2885_s22, %s2049_s14  ;;  %769 = sbr.rel (%p1969_p1) target bundleno = 81 (0x51), region = 100 }
  0x45   : > { %s757_s17 = scalar_lea.vmem %s2887_s0, %s2581_s12  ;;  %s2890_s22 = sld [smem:[#allocation19_spill]] (!%p1969_p1) }
  0x46   : > { %s2621_s28 = scalar_lea.vmem %s2888_s8, %s2052_s16 }
  0x47   : > { %s749_s11 = scalar_lea.vmem %s2886_s25, %s2581_s12 }
  0x48   : > { %s760_s5 = scalar_lea.vmem %s2889_s19, %s2581_s12 }
  0x4b   : > { %v782_v1 = vld [vmem:[%s2890_s22] sm:$0xff]  ;;  %v784_v2 = vld [vmem:[%s2890_s22 + $0x8] sm:$0xff] }
  0x4c   : > { %783 = vst [vmem:[#allocation2] sm:$0xff] %v782_v1 }
  0x4d   : > { %785 = vst [vmem:[#allocation2 + $0x8] sm:$0xff] %v784_v2 }
  0x4e   : > { %791 = vsyncadd [#allocation3], 256 }
  0x4f   : > { %2335 = dma.done.wait [#allocation3], 256 }
  0x50   : > { %2336 = vsyncadd [#allocation3], 4294967040 }
  0x51 PF: > { %v2054_v3 = vld [vmem:[%s727_s26 + $0x8] sm:$0xff]  ;;  %v2053_v4 = vld [vmem:[%s727_s26] sm:$0xff]  ;;  %vm818_vm0 = vcmask 261120   ;;  %s2364_s3 = smov 96   ;;  %s2365_s0 = smov 88   ;;  %vm847_vm1 = vcmask 64512  }
  0x52   : > { %828 = vmatpush.bf16.msra.mxu0 %v2054_v3  ;;  %v2151_v8 = vld [vmem:[%s730_s20] ss:$0 sm:$0xff]  ;;  %s2366_s19 = smov 120   ;;  %s2367_s20 = smov 56   ;;  %vm922_vm2 = vcmask 1043456   ;;  %vm1538_vm10 = vcmask 523264  }
  0x53   : > { %v2634_v5 = vld [vmem:[#allocation2] sm:$0xff]  ;;  %s2368_s26 = smov 80   ;;  %s2369_s8 = smov 64  }
  0x54   : > { %v2636_v6 = vld [vmem:[#allocation2 + $0x8] sm:$0xff]  ;;  %s2370_s25 = smov 112   ;;  %s2371_s16 = smov 48  }
  0x55   : > { %v797_v7 = vpack.c.bf16 %v2636_v6, %v2634_v5  ;;  %s2372_s24 = smov 72   ;;  %s2373_s15 = smov 104  }
  0x56   : > { %829 = vmatpush.bf16.msra.mxu0 %v2053_v4  ;;  %s2374_s7 = smov 40   ;;  %s2891_s14 = scalar_lea.vmem %s2835_s4, %s2581_s12 }
  0x57   : > { %s2893_s18 = scalar_lea.vmem %s2837_s6, %s2581_s12  ;;  %p2025_p3 = scmp.ne.s32.totalorder %s2351_s29, 1 }
  0x58   : > { %s2898_s12 = sld [smem:[#allocation32_spill]] (!%p2025_p3) }
  0x59   : > { %1978 = vmatmul.msk.bf16.vlgmr.msra.gmra.mxu0 %vm818_vm0, %v797_v7  ;;  %s2900_s9 = sld [smem:[#allocation33_spill]] (!%p2025_p3) }
  0xd6   : > { %v831_v9 = vpop.f32.mrf.mxu0 }
  0xd7   : > { %v832_v10 = vadd.f32 %v2151_v8, %v831_v9 }
  0xd9   : > { %v836_v11 = vpack.c.bf16 %v832_v10, %v832_v10 }
  0xdb   : > { %v843_v12 = vunpack.c.l.b16 %v836_v11 }
  0xdd   : > { %v2641_v13 = vpack.c.b16 %v843_v12, %v843_v12 }
  0xde   : > { %v833_v14 = vpop.f32.mrf.mxu0 }
  0xdf   : > { %v834_v15 = vadd.f32 %v2151_v8, %v833_v14  ;;  %845 = vrot.lane.b32.xlu1 %v2641_v13, %s2364_s3  ;;  %963 = vrot.lane.b32.xlu0 %v2641_v13, %s2365_s0 }
  0xe1   : > { %v837_v16 = vpack.c.bf16 %v834_v15, %v834_v15 }
  0xe3   : > { %v868_v17 = vunpack.c.l.b16 %v837_v16 }
  0xe5   : > { %v2645_v18 = vpack.c.b16 %v868_v17, %v868_v17 }
  0xe7   : > { %986 = vrot.lane.b32.xlu2 %v2645_v18, %s2365_s0  ;;  %870 = vrot.lane.b32.xlu1 %v2645_v18, %s2364_s3 }
  0xe8   : > { %961 = vrot.lane.b32.xlu0 %v2641_v13, %s2366_s19 }
  0xef   : > { %984 = vrot.lane.b32.xlu2 %v2645_v18, %s2366_s19 }
  0xf7   : > { %1033 = vrot.lane.b32.xlu2 %v2641_v13, %s2367_s20 }
 0x141   : > { %v987_v19 = vpop.permute.xlu2 %986 }
 0x142   : > { %v992_v25 = vsel %vm847_vm1, %v987_v19, 0 }
 0x149   : > { %v985_v20 = vpop.permute.xlu2 %984 }
 0x151   : > { %v846_v21 = vpop.permute.xlu1 %845  ;;  %v964_v22 = vpop.permute.xlu0 %963 }
 0x152   : > { %v852_v23 = vsel %vm847_vm1, %v846_v21, 0  ;;  %v969_v24 = vsel %vm847_vm1, %v964_v22, 0  ;;  %v1034_v26 = vpop.permute.xlu2 %1033 }
 0x153   : > { %861 = vmatpush.bf16.xpose.msra.mxu1 %v852_v23  ;;  %978 = vmatpush.bf16.xpose.msrb.mxu0 %v969_v24  ;;  %v1039_v30 = vsel %vm922_vm2, %v1034_v26, 0 }
 0x159   : > { %v871_v27 = vpop.permute.xlu1 %870 }
 0x15a   : > { %v962_v28 = vpop.permute.xlu0 %961  ;;  %1979 = vmatmul.msk.bf16.vlgmr.msra.gmra.mxu1 %vm847_vm1, %v836_v11  ;;  %v876_v29 = vsel %vm847_vm1, %v871_v27, 0  ;;  %v839_v11 = vld [vmem:[%s2594_s1 + $0x4] sm:$0xf] }
 0x15b   : > { %1001 = vmatpush.bf16.xpose.msrb.mxu1 %v992_v25  ;;  %1983 = vmatmul.msk.bf16.vlgmr.msrb.gmra.mxu0 %vm847_vm1, %v962_v28  ;;  %v1080_v12 = vsel %vm922_vm2, %v839_v11, 0 }
 0x15c   : > { %885 = vmatpush.bf16.xpose.msra.mxu2 %v876_v29  ;;  %1089 = vmatpush.bf16.msra.mxu0 %v1080_v12 }
 0x163   : > { %1980 = vmatmul.msk.bf16.vlgmr.msra.gmra.mxu2 %vm847_vm1, %v837_v16 }
 0x164   : > { %1048 = vmatpush.bf16.msrb.mxu2 %v1039_v30 }
 0x16a   : > { %1984 = vmatmul.msk.bf16.vlgmr.msrb.gmra.mxu1 %vm847_vm1, %v985_v20 }
 0x1d7   : > { %v863_v31 = vpop.f32.mrf.mxu1 }
 0x1d8   : > { %v891_v32 = vmul.f32 0.35355338, %v863_v31  ;;  %v980_v33 = vpop.f32.mrf.mxu0 }
 0x1d9   : > { %v1007_v34 = vmul.f32 0.35355338, %v980_v33 }
 0x1da   : > { %v893_v35 = vsel %vm847_vm1, %v891_v32, -inf }
 0x1db   : > { %894 = vmax.xlane.f32.xlu2 %v893_v35  ;;  %v1009_v36 = vsel %vm847_vm1, %v1007_v34, -inf }
 0x1dc   : > { %1010 = vmax.xlane.f32.xlu0 %v1009_v36 }
 0x1df   : > { %v865_v37 = vpop.f32.mrf.mxu1 }
 0x1e0   : > { %v982_v38 = vpop.f32.mrf.mxu0 }
 0x1e6   : > { %v887_v39 = vpop.f32.mrf.mxu2 }
 0x1e7   : > { %v892_v40 = vmul.f32 0.35355338, %v887_v39  ;;  %v1003_v41 = vpop.f32.mrf.mxu1 }
 0x1e8   : > { %v1008_v43 = vmul.f32 0.35355338, %v1003_v41 }
 0x1e9   : > { %v896_v42 = vsel %vm847_vm1, %v892_v40, -inf }
 0x1ea   : > { %897 = vmax.xlane.f32.xlu2 %v896_v42  ;;  %v1012_v46 = vsel %vm847_vm1, %v1008_v43, -inf }
 0x1ee   : > { %v889_v44 = vpop.f32.mrf.mxu2 }
 0x1ef   : > { %v1005_v45 = vpop.f32.mrf.mxu1 }
 0x1f0   : > { %1118 = vrot.lane.b32.xlu0 %v2641_v13, %s2368_s26 }
 0x1f2   : > { %1013 = vmax.xlane.f32.xlu2 %v1012_v46 }
 0x20a   : > { %917 = vrot.lane.b32.xlu2 %v2641_v13, %s2369_s8 }
 0x212   : > { %939 = vrot.lane.b32.xlu2 %v2645_v18, %s2369_s8 }
 0x24e   : > { %v895_v47 = vpop.xlane.xlu2 %894 }
 0x24f   : > { %v899_v48 = vsub.f32 %v891_v32, %v895_v47  ;;  %v1011_v49 = vpop.xlane.xlu0 %1010 }
 0x250   : > { %v1015_v50 = vsub.f32 %v1007_v34, %v1011_v49  ;;  %v838_v49 = vld [vmem:[%s2594_s1] sm:$0xf] }
 0x251   : > { %v901_v51 = vmul.f32 1.442695, %v899_v48 }
 0x252   : > { %v1017_v52 = vmul.f32 1.442695, %v1015_v50  ;;  %v1100_v50 = vsel %vm922_vm2, %v838_v49, 0 }
 0x253   : > { %2159 = vpow2.f32 %v901_v51  ;;  %1109 = vmatpush.bf16.msra.mxu1 %v1100_v50 }
 0x254   : > { %2161 = vpow2.f32 %v1017_v52 }
 0x259   : > { %v2160_v53 = vpop.eup %2159 }
 0x25a   : > { %v2162_v54 = vpop.eup %2161  ;;  %v905_v55 = vsel %vm847_vm1, %v2160_v53, 0.0 }
 0x25b   : > { %906 = vadd.xlane.f32.xlu0 %v905_v55  ;;  %v1021_v56 = vsel %vm847_vm1, %v2162_v54, 0.0 }
 0x25c   : > { %1022 = vadd.xlane.f32.xlu1 %v1021_v56 }
 0x25d   : > { %v898_v57 = vpop.xlane.xlu2 %897 }
 0x25e   : > { %v900_v7 = vsub.f32 %v892_v40, %v898_v57 }
 0x260   : > { %v903_v8 = vmul.f32 1.442695, %v900_v7 }
 0x262   : > { %v1119_v58 = vpop.permute.xlu0 %1118 }
 0x263   : > { %v1124_v59 = vsel %vm847_vm1, %v1119_v58, 0 }
 0x264   : > { %1133 = vmatpush.bf16.xpose.msra.mxu2 %v1124_v59 }
 0x265   : > { %v1014_v60 = vpop.xlane.xlu2 %1013 }
 0x266   : > { %v1016_v61 = vsub.f32 %v1008_v43, %v1014_v60 }
 0x268   : > { %v1019_v62 = vmul.f32 1.442695, %v1016_v61 }
 0x26a   : > { %2163 = vpow2.f32 %v1019_v62 }
 0x26b   : > { %2165 = vpow2.f32 %v903_v8 }
 0x26d   : > { %v918_v63 = vpop.permute.xlu2 %917 }
 0x26e   : > { %v924_v0 = vsel %vm922_vm2, %v918_v63, 0 }
 0x26f   : > { %933 = vmatpush.bf16.msra.mxu3 %v924_v0  ;;  %1054 = vrot.lane.b32.xlu0 %v2645_v18, %s2367_s20 }
 0x270   : > { %v2164_v1 = vpop.eup %2163 }
 0x271   : > { %v1024_v2 = vsel %vm847_vm1, %v2164_v1, 0.0  ;;  %v2166_v9 = vpop.eup %2165 }
 0x272   : > { %1025 = vadd.xlane.f32.xlu2 %v1024_v2  ;;  %v908_v10 = vsel %vm847_vm1, %v2166_v9, 0.0 }
 0x275   : > { %v940_v3 = vpop.permute.xlu2 %939  ;;  %1116 = vrot.lane.b32.xlu1 %v2641_v13, %s2370_s25 }
 0x276   : > { %v945_v4 = vsel %vm922_vm2, %v940_v3, 0 }
 0x277   : > { %954 = vmatpush.bf16.msrb.mxu3 %v945_v4  ;;  %1139 = vrot.lane.b32.xlu0 %v2645_v18, %s2370_s25 }
 0x28a   : > { %1188 = vrot.lane.b32.xlu2 %v2641_v13, %s2371_s16 }
 0x292   : > { %1255 = vrot.lane.b32.xlu2 %v2641_v13, %s2372_s24 }
 0x29a   : > { %1278 = vrot.lane.b32.xlu2 %v2645_v18, %s2372_s24 }
 0x29f   : > { %909 = vadd.xlane.f32.xlu1 %v908_v10 }
 0x2b8   : > { %1141 = vrot.lane.b32.xlu1 %v2645_v18, %s2368_s26 }
 0x2ce   : > { %v907_v14 = vpop.xlane.xlu0 %906 }
 0x2cf   : > { %v1023_v15 = vpop.xlane.xlu1 %1022  ;;  %2167 = vrcp.f32 %v907_v14 }
 0x2d0   : > { %2169 = vrcp.f32 %v1023_v15 }
 0x2d5   : > { %v2168_v16 = vpop.eup %2167 }
 0x2d6   : > { %v2170_v17 = vpop.eup %2169  ;;  %v913_v19 = vmul.f32 %v2168_v16, %v2160_v53 }
 0x2d7   : > { %v1029_v20 = vmul.f32 %v2170_v17, %v2162_v54 }
 0x2d8   : > { %v915_v21 = vpack.c.bf16 %v913_v19, %v913_v19 }
 0x2d9   : > { %v1031_v22 = vpack.c.bf16 %v1029_v20, %v1029_v20 }
 0x2da   : > { %1981 = vmatmul.msk.bf16.vlgmr.msra.gmra.mxu3 %vm847_vm1, %v915_v21 }
 0x2db   : > { %1985 = vmatmul.msk.bf16.vlgmr.msrb.gmra.mxu2 %vm847_vm1, %v1031_v22 }
 0x2e1   : > { %v1055_v23 = vpop.permute.xlu0 %1054 }
 0x2e2   : > { %v1060_v24 = vsel %vm922_vm2, %v1055_v23, 0 }
 0x2e3   : > { %1069 = vmatpush.bf16.msra.mxu3 %v1060_v24 }
 0x2e5   : > { %v1026_v25 = vpop.xlane.xlu2 %1025 }
 0x2e7   : > { %v1117_v26 = vpop.permute.xlu1 %1116 }
 0x2e9   : > { %v1140_v40 = vpop.permute.xlu0 %1139 }
 0x2eb   : > { %1989 = vmatmul.msk.bf16.vlgmr.msra.gmra.mxu2 %vm847_vm1, %v1117_v26 }
 0x2ed   : > { %v1189_v27 = vpop.permute.xlu2 %1188 }
 0x2ee   : > { %v1194_v28 = vsel %vm922_vm2, %v1189_v27, 0  ;;  %v840_v27 = vld [vmem:[%s2594_s1 + $0x8] sm:$0xf] }
 0x2ef   : > { %1203 = vmatpush.bf16.msrb.mxu0 %v1194_v28  ;;  %v1235_v28 = vsel %vm922_vm2, %v840_v27, 0  ;;  %v2375_v27 = vmov 32.0  }
 0x2f0   : > { %1244 = vmatpush.bf16.msrb.mxu2 %v1235_v28 }
 0x2f5   : > { %v1256_v36 = vpop.permute.xlu2 %1255 }
 0x2f6   : > { %v1261_v39 = vsel %vm847_vm1, %v1256_v36, 0 }
 0x2fd   : > { %v1279_v54 = vpop.permute.xlu2 %1278 }
 0x2fe   : > { %v1284_v57 = vsel %vm847_vm1, %v1279_v54, 0 }
 0x312   : > { %v910_v29 = vpop.xlane.xlu1 %909 }
 0x313   : > { %2171 = vrcp.f32 %v910_v29 }
 0x314   : > { %2173 = vrcp.f32 %v1026_v25 }
 0x319   : > { %v2172_v30 = vpop.eup %2171 }
 0x31a   : > { %v914_v31 = vmul.f32 %v2172_v30, %v2166_v9  ;;  %v2174_v33 = vpop.eup %2173 }
 0x31b   : > { %v1030_v34 = vmul.f32 %v2174_v33, %v2164_v1 }
 0x31c   : > { %v916_v32 = vpack.c.bf16 %v914_v31, %v914_v31 }
 0x31d   : > { %v1032_v38 = vpack.c.bf16 %v1030_v34, %v1030_v34 }
 0x31e   : > { %1982 = vmatmul.msk.bf16.vlgmr.msrb.gmra.mxu3 %vm847_vm1, %v916_v32 }
 0x32a   : > { %v1142_v35 = vpop.permute.xlu1 %1141 }
 0x32b   : > { %v1147_v37 = vsel %vm847_vm1, %v1142_v35, 0 }
 0x32c   : > { %1156 = vmatpush.bf16.xpose.msrb.mxu3 %v1147_v37 }
 0x32e   : > { %1986 = vmatmul.msk.bf16.vlgmr.msra.gmra.mxu3 %vm847_vm1, %v1032_v38 }
 0x334   : > { %1270 = vmatpush.bf16.xpose.msra.mxu3 %v1261_v39 }
 0x33e   : > { %1990 = vmatmul.msk.bf16.vlgmr.msrb.gmra.mxu3 %vm847_vm1, %v1140_v40 }
 0x35d   : > { %v935_v41 = vpop.f32.mrf.mxu3 }
 0x35e   : > { %v1050_v42 = vpop.f32.mrf.mxu2 }
 0x365   : > { %v937_v43 = vpop.f32.mrf.mxu3 }
 0x366   : > { %v1052_v44 = vpop.f32.mrf.mxu2 }
 0x36e   : > { %v1135_v45 = vpop.f32.mrf.mxu2 }
 0x36f   : > { %v1162_v46 = vmul.f32 0.35355338, %v1135_v45 }
 0x371   : > { %v1164_v47 = vsel %vm847_vm1, %v1162_v46, -inf }
 0x372   : > { %1165 = vmax.xlane.f32.xlu0 %v1164_v47 }
 0x376   : > { %v1137_v48 = vpop.f32.mrf.mxu2 }
 0x386   : > { %1253 = vrot.lane.b32.xlu0 %v2641_v13, %s2373_s15 }
 0x3a1   : > { %v956_v51 = vpop.f32.mrf.mxu3 }
 0x3a2   : > { %v960_v52 = vpack.c.bf16 %v956_v51, %v935_v41 }
 0x3a4   : > { %1988 = vmatmul.msk.bf16.vlgmr.msra.gmra.mxu1 %vm847_vm1, %v960_v52 }
 0x3a9   : > { %v958_v53 = vpop.f32.mrf.mxu3 }
 0x3b1   : > { %v1071_v55 = vpop.f32.mrf.mxu3 }
 0x3b2   : > { %v1075_v56 = vpack.c.bf16 %v1071_v55, %v1050_v42 }
 0x3b4   : > { %1987 = vmatmul.msk.bf16.vlgmr.msra.gmra.mxu0 %vm847_vm1, %v1075_v56 }
 0x3b5   : > { %1293 = vmatpush.bf16.xpose.msra.mxu0 %v1284_v57 }
 0x3b9   : > { %v1073_v58 = vpop.f32.mrf.mxu3 }
 0x3c1   : > { %v1158_v59 = vpop.f32.mrf.mxu3 }
 0x3c2   : > { %v1163_v60 = vmul.f32 0.35355338, %v1158_v59 }
 0x3c4   : > { %v1167_v61 = vsel %vm847_vm1, %v1163_v60, -inf }
 0x3c5   : > { %1168 = vmax.xlane.f32.xlu2 %v1167_v61 }
 0x3c9   : > { %v1160_v62 = vpop.f32.mrf.mxu3 }
 0x3e5   : > { %v1166_v63 = vpop.xlane.xlu0 %1165 }
 0x3e6   : > { %v1170_v0 = vsub.f32 %v1162_v46, %v1166_v63 }
 0x3e8   : > { %v1172_v1 = vmul.f32 1.442695, %v1170_v0 }
 0x3ea   : > { %2175 = vpow2.f32 %v1172_v1 }
 0x3f0   : > { %v2176_v2 = vpop.eup %2175 }
 0x3f1   : > { %v1176_v3 = vsel %vm847_vm1, %v2176_v2, 0.0 }
 0x3f2   : > { %1177 = vadd.xlane.f32.xlu1 %v1176_v3 }
 0x3f8   : > { %v1254_v4 = vpop.permute.xlu0 %1253 }
 0x3f9   : > { %1994 = vmatmul.msk.bf16.vlgmr.msra.gmra.mxu3 %vm847_vm1, %v1254_v4 }
 0x40b   : > { %1276 = vrot.lane.b32.xlu1 %v2645_v18, %s2373_s15  ;;  %s2899_s15 = sld [smem:[#allocation31_spill]] (!%p2025_p3) }
 0x413   : > { %1209 = vrot.lane.b32.xlu1 %v2645_v18, %s2371_s16 }
 0x421   : > { %v1111_v7 = vpop.f32.mrf.mxu1 }
 0x429   : > { %v1113_v47 = vpop.f32.mrf.mxu1 }
 0x431   : > { %v1091_v8 = vpop.f32.mrf.mxu0 }
 0x432   : > { %v2712_v9 = vadd.f32 %v1111_v7, %v1091_v8 }
 0x438   : > { %v1169_v10 = vpop.xlane.xlu2 %1168 }
 0x439   : > { %v1171_v11 = vsub.f32 %v1163_v60, %v1169_v10  ;;  %v1093_v35 = vpop.f32.mrf.mxu0 }
 0x43b   : > { %v1174_v12 = vmul.f32 1.442695, %v1171_v11 }
 0x43d   : > { %2177 = vpow2.f32 %v1174_v12 }
 0x443   : > { %v2178_v14 = vpop.eup %2177 }
 0x444   : > { %v1179_v15 = vsel %vm847_vm1, %v2178_v14, 0.0 }
 0x445   : > { %1180 = vadd.xlane.f32.xlu0 %v1179_v15 }
 0x459   : > { %1346 = vrot.lane.b32.xlu0 %v2645_v18, %s2374_s7 }
 0x465   : > { %v1178_v16 = vpop.xlane.xlu1 %1177 }
 0x466   : > { %2179 = vrcp.f32 %v1178_v16 }
 0x46c   : > { %v2180_v17 = vpop.eup %2179 }
 0x46d   : > { %v1184_v19 = vmul.f32 %v2180_v17, %v2176_v2 }
 0x46f   : > { %v1186_v20 = vpack.c.bf16 %v1184_v19, %v1184_v19  ;;  %v1114_v19 = vadd.f32 %v1113_v47, %v1093_v35 }
 0x471   : > { %1991 = vmatmul.msk.bf16.vlgmr.msrb.gmra.mxu0 %vm847_vm1, %v1186_v20 }
 0x47c   : > { %v1272_v21 = vpop.f32.mrf.mxu3 }
 0x47d   : > { %v1299_v22 = vmul.f32 0.35355338, %v1272_v21  ;;  %v1277_v23 = vpop.permute.xlu1 %1276 }
 0x47f   : > { %v1301_v24 = vsel %vm847_vm1, %v1299_v22, -inf }
 0x480   : > { %1302 = vmax.xlane.f32.xlu2 %v1301_v24 }
 0x481   : > { %1995 = vmatmul.msk.bf16.vlgmr.msra.gmra.mxu0 %vm847_vm1, %v1277_v23 }
 0x484   : > { %v1274_v25 = vpop.f32.mrf.mxu3 }
 0x485   : > { %v1210_v26 = vpop.permute.xlu1 %1209 }
 0x486   : > { %v1215_v18 = vsel %vm922_vm2, %v1210_v26, 0 }
 0x487   : > { %1224 = vmatpush.bf16.msrb.mxu1 %v1215_v18 }
 0x4b8   : > { %v1181_v29 = vpop.xlane.xlu0 %1180 }
 0x4b9   : > { %2181 = vrcp.f32 %v1181_v29 }
 0x4bf   : > { %v2182_v30 = vpop.eup %2181 }
 0x4c0   : > { %v1185_v31 = vmul.f32 %v2182_v30, %v2178_v14  ;;  %v2152_v14 = vld [vmem:[%s2891_s14] ss:$0 sm:$0xff] }
 0x4c2   : > { %v1187_v32 = vpack.c.bf16 %v1185_v31, %v1185_v31 }
 0x4c4   : > { %1992 = vmatmul.msk.bf16.vlgmr.msrb.gmra.mxu1 %vm847_vm1, %v1187_v32 }
 0x4cb   : > { %v1347_v33 = vpop.permute.xlu0 %1346 }
 0x4cc   : > { %v1352_v34 = vsel %vm922_vm2, %v1347_v33, 0 }
 0x4cd   : > { %1361 = vmatpush.bf16.msra.mxu2 %v1352_v34 }
 0x4ee   : > { %v1205_v36 = vpop.f32.mrf.mxu0 }
 0x4f3   : > { %v1303_v37 = vpop.xlane.xlu2 %1302 }
 0x4f4   : > { %v1307_v38 = vsub.f32 %v1299_v22, %v1303_v37 }
 0x4f6   : > { %v1309_v39 = vmul.f32 1.442695, %v1307_v38  ;;  %v1207_v40 = vpop.f32.mrf.mxu0 }
 0x4f8   : > { %2183 = vpow2.f32 %v1309_v39 }
 0x4fe   : > { %v2184_v41 = vpop.eup %2183  ;;  %v1295_v42 = vpop.f32.mrf.mxu0 }
 0x4ff   : > { %v1300_v43 = vmul.f32 0.35355338, %v1295_v42  ;;  %v1313_v44 = vsel %vm847_vm1, %v2184_v41, 0.0  ;;  %v2056_v42 = vld [vmem:[%s2607_s2 + $0x8] sm:$0xff] }
 0x500   : > { %1314 = vadd.xlane.f32.xlu2 %v1313_v44  ;;  %1491 = vmatpush.bf16.msrb.mxu0 %v2056_v42 }
 0x501   : > { %v1304_v45 = vsel %vm847_vm1, %v1300_v43, -inf }
 0x502   : > { %1305 = vmax.xlane.f32.xlu1 %v1304_v45 }
 0x506   : > { %v1297_v46 = vpop.f32.mrf.mxu0 }
 0x507   : > { %v2055_v46 = vld [vmem:[%s2607_s2] sm:$0xff]  ;;  %s2892_s2 = scalar_lea.vmem [#allocation5], %s2560_s13 }
 0x508   : > { %1492 = vmatpush.bf16.msrb.mxu0 %v2055_v46 }
 0x541   : > { %v1226_v48 = vpop.f32.mrf.mxu1 }
 0x542   : > { %v1230_v49 = vpack.c.bf16 %v1226_v48, %v1205_v36 }
 0x544   : > { %1993 = vmatmul.msk.bf16.vlgmr.msrb.gmra.mxu2 %vm847_vm1, %v1230_v49 }
 0x549   : > { %v1228_v50 = vpop.f32.mrf.mxu1 }
 0x573   : > { %v1315_v58 = vpop.xlane.xlu2 %1314 }
 0x575   : > { %v1306_v51 = vpop.xlane.xlu1 %1305 }
 0x576   : > { %v1308_v52 = vsub.f32 %v1300_v43, %v1306_v51 }
 0x578   : > { %v1311_v53 = vmul.f32 1.442695, %v1308_v52 }
 0x57a   : > { %2185 = vpow2.f32 %v1311_v53 }
 0x57b   : > { %2187 = vrcp.f32 %v1315_v58 }
 0x580   : > { %v2186_v54 = vpop.eup %2185 }
 0x581   : > { %v1316_v55 = vsel %vm847_vm1, %v2186_v54, 0.0  ;;  %v2188_v60 = vpop.eup %2187 }
 0x582   : > { %1317 = vadd.xlane.f32.xlu2 %v1316_v55  ;;  %v1321_v62 = vmul.f32 %v2188_v60, %v2184_v41 }
 0x584   : > { %v1323_v3 = vpack.c.bf16 %v1321_v62, %v1321_v62  ;;  %v2153_v62 = vld [vmem:[%s2892_s2] ss:$0 sm:$0xff] }
 0x59a   : > { %1325 = vrot.lane.b32.xlu2 %v2641_v13, %s2374_s7  ;;  %v841_v13 = vld [vmem:[%s2594_s1 + $0xc] sm:$0xf] }
 0x59b   : > { %v1372_v4 = vsel %vm922_vm2, %v841_v13, 0 }
 0x59c   : > { %1381 = vmatpush.bf16.msrb.mxu3 %v1372_v4 }
 0x5c7   : > { %v1246_v56 = vpop.f32.mrf.mxu2 }
 0x5c8   : > { %v1251_v57 = vadd.f32 %v1246_v56, %v2712_v9 }
 0x5cf   : > { %v1248_v7 = vpop.f32.mrf.mxu2 }
 0x5d0   : > { %v1252_v21 = vadd.f32 %v1248_v7, %v1114_v19 }
 0x5f5   : > { %v1318_v59 = vpop.xlane.xlu2 %1317 }
 0x5f6   : > { %2189 = vrcp.f32 %v1318_v59 }
 0x5f7   : > { %2191 = vrcp.f32 %v2375_v27 }
 0x5fc   : > { %v2190_v61 = vpop.eup %2189 }
 0x5fd   : > { %v1322_v63 = vmul.f32 %v2190_v61, %v2186_v54  ;;  %v1326_v0 = vpop.permute.xlu2 %1325  ;;  %v2192_v28 = vpop.eup %2191 }
 0x5fe   : > { %v1331_v1 = vsel %vm922_vm2, %v1326_v0, 0  ;;  %v1407_v29 = vmul.f32 32.0, %v2192_v28  ;;  %vm1411_vm3 = vweird.f32 %v2192_v28 }
 0x5ff   : > { %v1324_v2 = vpack.c.bf16 %v1322_v63, %v1322_v63  ;;  %1340 = vmatpush.bf16.msra.mxu1 %v1331_v1 }
 0x600   : > { %v1408_v30 = vsub.f32 1.0, %v1407_v29 }
 0x601   : > { %1997 = vmatmul.msk.bf16.vlgmr.msra.gmra.mxu2 %vm847_vm1, %v1324_v2  ;;  %v2154_v2 = vld [vmem:[%s2893_s18] ss:$0 sm:$0xff] }
 0x602   : > { %1996 = vmatmul.msk.bf16.vlgmr.msra.gmra.mxu1 %vm847_vm1, %v1323_v3  ;;  %v1409_v31 = vmul.f32 %v2192_v28, %v1408_v30 }
 0x67f   : > { %v1342_v8 = vpop.f32.mrf.mxu1 }
 0x684   : > { %v1363_v9 = vpop.f32.mrf.mxu2 }
 0x685   : > { %v1367_v10 = vpack.c.bf16 %v1363_v9, %v1342_v8 }
 0x687   : > { %v1344_v11 = vpop.f32.mrf.mxu1  ;;  %1998 = vmatmul.msk.bf16.vlgmr.msrb.gmra.mxu3 %vm847_vm1, %v1367_v10  ;;  %v2060_v10 = vld [vmem:[%s2621_s28 + $0x18] sm:$0xff] }
 0x688   : > { %1546 = vmatpush.bf16.msrb.mxu1 %v2060_v10  ;;  %v2059_v11 = vld [vmem:[%s2621_s28 + $0x10] sm:$0xff] }
 0x68c   : > { %v1365_v12 = vpop.f32.mrf.mxu2  ;;  %1547 = vmatpush.bf16.msrb.mxu1 %v2059_v11 }
 0x68d   : > { %v2058_v12 = vld [vmem:[%s2621_s28 + $0x8] sm:$0xff] }
 0x690   : > { %1548 = vmatpush.bf16.msrb.mxu1 %v2058_v12 }
 0x70a   : > { %v1383_v15 = vpop.f32.mrf.mxu3 }
 0x70b   : > { %v1388_v16 = vadd.f32 %v1383_v15, %v1251_v57 }
 0x70d   : > { %v1394_v17 = vadd.f32 %v2152_v14, %v1388_v16  ;;  %v2155_v16 = vld [vmem:[%s749_s11] ss:$0 sm:$0xff]  ;;  %s2896_s11 = scalar_lea.vmem [#allocation7], %s2560_s13 }
 0x70f   : > { %v1396_v20 = vadd.f32 %v1394_v17, %v2634_v5  ;;  %v1410_v5 = vadd.f32 %v2192_v28, %v1409_v31 }
 0x711   : > { %v1400_v22 = vsel %vm818_vm0, %v1396_v20, 0.0  ;;  %v2747_v32 = vsel %vm1411_vm3, %v2192_v28, %v1410_v5 }
 0x712   : > { %1401 = vadd.xlane.f32.xlu1 %v1400_v22  ;;  %v1385_v23 = vpop.f32.mrf.mxu3 }
 0x713   : > { %v1389_v24 = vadd.f32 %v1385_v23, %v1252_v21 }
 0x715   : > { %v1395_v25 = vadd.f32 %v2152_v14, %v1389_v24  ;;  %v2057_v14 = vld [vmem:[%s2621_s28] sm:$0xff] }
 0x716   : > { %1549 = vmatpush.bf16.msrb.mxu1 %v2057_v14  ;;  %v2156_v24 = vld [vmem:[%s757_s17] ss:$0 sm:$0xff] }
 0x717   : > { %v1397_v26 = vadd.f32 %v1395_v25, %v2636_v6 }
 0x719   : > { %v1403_v18 = vsel %vm818_vm0, %v1397_v26, 0.0 }
 0x71a   : > { %1404 = vadd.xlane.f32.xlu0 %v1403_v18 }
 0x785   : > { %v1402_v33 = vpop.xlane.xlu1 %1401 }
 0x786   : > { %v1413_v34 = vmul.f32 %v2747_v32, %v1402_v33 }
 0x788   : > { %v1415_v35 = vsub.f32 %v1396_v20, %v1413_v34 }
 0x78a   : > { %v1417_v6 = vmul.f32 %v1415_v35, %v1415_v35 }
 0x78c   : > { %v1419_v36 = vsel %vm818_vm0, %v1417_v6, 0.0 }
 0x78d   : > { %1420 = vadd.xlane.f32.xlu1 %v1419_v36  ;;  %v1405_v37 = vpop.xlane.xlu0 %1404 }
 0x78e   : > { %v1414_v38 = vmul.f32 %v2747_v32, %v1405_v37 }
 0x790   : > { %v1416_v39 = vsub.f32 %v1397_v26, %v1414_v38 }
 0x792   : > { %v1418_v40 = vmul.f32 %v1416_v39, %v1416_v39 }
 0x794   : > { %v1422_v41 = vsel %vm818_vm0, %v1418_v40, 0.0 }
 0x795   : > { %1423 = vadd.xlane.f32.xlu1 %v1422_v41 }
 0x800   : > { %v1421_v43 = vpop.xlane.xlu1 %1420 }
 0x801   : > { %v1425_v44 = vmul.f32 %v1421_v43, %v2747_v32 }
 0x803   : > { %v1427_v45 = vadd.f32 1e-05, %v1425_v44 }
 0x805   : > { %2193 = vrsqrt.f32 %v1427_v45  ;;  %vm1435_vm5 = vweird.f32 %v1427_v45 }
 0x808   : > { %v1424_v47 = vpop.xlane.xlu1 %1423 }
 0x809   : > { %v1426_v48 = vmul.f32 %v1424_v47, %v2747_v32 }
 0x80b   : > { %v2194_v49 = vpop.eup %2193  ;;  %v1428_v50 = vadd.f32 1e-05, %v1426_v48 }
 0x80c   : > { %v1430_v51 = vmul.f32 %v2194_v49, %v1427_v45  ;;  %vm1436_vm4 = vweird.f32 %v2194_v49 }
 0x80d   : > { %2195 = vrsqrt.f32 %v1428_v50  ;;  %vm1437_vm6 = vmor %vm1435_vm5, %vm1436_vm4  ;;  %vm1445_vm8 = vweird.f32 %v1428_v50 }
 0x80e   : > { %v1431_v52 = vmul.f32 %v2194_v49, %v1430_v51 }
 0x810   : > { %v1432_v53 = vmul.f32 0.5, %v1431_v52 }
 0x812   : > { %v1433_v54 = vsub.f32 1.5, %v1432_v53 }
 0x813   : > { %v2196_v55 = vpop.eup %2195 }
 0x814   : > { %v1434_v56 = vmul.f32 %v2194_v49, %v1433_v54  ;;  %v1440_v57 = vmul.f32 %v2196_v55, %v1428_v50  ;;  %vm1446_vm7 = vweird.f32 %v2196_v55 }
 0x815   : > { %vm1447_vm9 = vmor %vm1445_vm8, %vm1446_vm7 }
 0x816   : > { %v1441_v58 = vmul.f32 %v2196_v55, %v1440_v57  ;;  %v1438_v59 = vsel %vm1437_vm6, %v2194_v49, %v1434_v56 }
 0x817   : > { %v1449_v63 = vmul.f32 %v1438_v59, %v1415_v35 }
 0x818   : > { %v1442_v60 = vmul.f32 0.5, %v1441_v58 }
 0x819   : > { %v1454_v3 = vmul.f32 %v2153_v62, %v1449_v63 }
 0x81a   : > { %v1443_v61 = vsub.f32 1.5, %v1442_v60 }
 0x81b   : > { %v1459_v7 = vadd.f32 %v2154_v2, %v1454_v3 }
 0x81c   : > { %v1444_v0 = vmul.f32 %v2196_v55, %v1443_v61 }
 0x81e   : > { %v1448_v1 = vsel %vm1447_vm9, %v2196_v55, %v1444_v0  ;;  %v2157_v55 = vld [vmem:[%s2896_s11] ss:$0 sm:$0xff] }
 0x81f   : > { %v1450_v13 = vmul.f32 %v1448_v1, %v1416_v39 }
 0x821   : > { %v1455_v4 = vmul.f32 %v2153_v62, %v1450_v13 }
 0x823   : > { %v1460_v8 = vadd.f32 %v2154_v2, %v1455_v4 }
 0x825   : > { %v1461_v9 = vpack.c.bf16 %v1460_v8, %v1459_v7 }
 0x827   : > { %2007 = vmatmul.msk.bf16.vlgmr.msrb.gmra.mxu0 %vm818_vm0, %v1461_v9 }
 0x8a4   : > { %v1494_v15 = vpop.f32.mrf.mxu0 }
 0x8a5   : > { %v1495_v17 = vadd.f32 %v2155_v16, %v1494_v15 }
 0x8a7   : > { %v1499_v21 = vmax.f32 %v1495_v17, 0.0 }
 0x8ac   : > { %v1496_v19 = vpop.f32.mrf.mxu0 }
 0x8ad   : > { %v1497_v20 = vadd.f32 %v2155_v16, %v1496_v19 }
 0x8af   : > { %v1500_v22 = vmax.f32 %v1497_v20, 0.0 }
 0x8b1   : > { %v1501_v23 = vpack.c.bf16 %v1500_v22, %v1499_v21 }
 0x8b3   : > { %2024 = vmatmul.msk.bf16.vlgmr.msrb.gmra.mxu1 %vm1538_vm10, %v1501_v23 }
 0x930   : > { %v1551_v25 = vpop.f32.mrf.mxu1 }
 0x931   : > { %v1552_v26 = vadd.f32 %v2156_v24, %v1551_v25 }
 0x933   : > { %v1556_v18 = vadd.f32 %v1552_v26, %v1459_v7 }
 0x935   : > { %v1560_v27 = vsel %vm818_vm0, %v1556_v18, 0.0 }
 0x936   : > { %1561 = vadd.xlane.f32.xlu2 %v1560_v27 }
 0x938   : > { %v1553_v28 = vpop.f32.mrf.mxu1 }
 0x939   : > { %v1554_v29 = vadd.f32 %v2156_v24, %v1553_v28 }
 0x93b   : > { %v1557_v30 = vadd.f32 %v1554_v29, %v1460_v8 }
 0x93d   : > { %v1563_v31 = vsel %vm818_vm0, %v1557_v30, 0.0 }
 0x93e   : > { %1564 = vadd.xlane.f32.xlu1 %v1563_v31 }
 0x9a9   : > { %v1562_v5 = vpop.xlane.xlu2 %1561 }
 0x9aa   : > { %v1566_v33 = vmul.f32 %v1562_v5, %v2747_v32 }
 0x9ac   : > { %v1568_v34 = vsub.f32 %v1556_v18, %v1566_v33 }
 0x9ae   : > { %v1570_v35 = vmul.f32 %v1568_v34, %v1568_v34 }
 0x9b0   : > { %v1572_v6 = vsel %vm818_vm0, %v1570_v35, 0.0 }
 0x9b1   : > { %v1565_v36 = vpop.xlane.xlu1 %1564  ;;  %1573 = vadd.xlane.f32.xlu1 %v1572_v6 }
 0x9b2   : > { %v1567_v37 = vmul.f32 %v1565_v36, %v2747_v32 }
 0x9b4   : > { %v1569_v38 = vsub.f32 %v1557_v30, %v1567_v37 }
 0x9b6   : > { %v1571_v39 = vmul.f32 %v1569_v38, %v1569_v38 }
 0x9b8   : > { %v1575_v40 = vsel %vm818_vm0, %v1571_v39, 0.0 }
 0x9b9   : > { %1576 = vadd.xlane.f32.xlu1 %v1575_v40 }
 0xa24   : > { %v1574_v41 = vpop.xlane.xlu1 %1573 }
 0xa25   : > { %v1578_v42 = vmul.f32 %v1574_v41, %v2747_v32 }
 0xa27   : > { %v1580_v43 = vadd.f32 1e-05, %v1578_v42 }
 0xa29   : > { %2197 = vrsqrt.f32 %v1580_v43  ;;  %vm1588_vm12 = vweird.f32 %v1580_v43 }
 0xa2c   : > { %v1577_v44 = vpop.xlane.xlu1 %1576 }
 0xa2d   : > { %v1579_v45 = vmul.f32 %v1577_v44, %v2747_v32  ;;  %v2158_v32 = vld [vmem:[%s760_s5] ss:$0 sm:$0xff] }
 0xa2f   : > { %v2198_v46 = vpop.eup %2197  ;;  %v1581_v47 = vadd.f32 1e-05, %v1579_v45 }
 0xa30   : > { %v1583_v48 = vmul.f32 %v2198_v46, %v1580_v43  ;;  %vm1589_vm11 = vweird.f32 %v2198_v46 }
 0xa31   : > { %2199 = vrsqrt.f32 %v1581_v47  ;;  %vm1590_vm13 = vmor %vm1588_vm12, %vm1589_vm11  ;;  %vm1598_vm15 = vweird.f32 %v1581_v47 }
 0xa32   : > { %v1584_v49 = vmul.f32 %v2198_v46, %v1583_v48 }
 0xa34   : > { %v1585_v50 = vmul.f32 0.5, %v1584_v49 }
 0xa36   : > { %v1586_v51 = vsub.f32 1.5, %v1585_v50 }
 0xa37   : > { %v2200_v52 = vpop.eup %2199 }
 0xa38   : > { %v1587_v53 = vmul.f32 %v2198_v46, %v1586_v51  ;;  %v1593_v54 = vmul.f32 %v2200_v52, %v1581_v47  ;;  %vm1599_vm14 = vweird.f32 %v2200_v52 }
 0xa39   : > { %vm1600_vm1 = vmor %vm1598_vm15, %vm1599_vm14 }
 0xa3a   : > { %v1591_v56 = vsel %vm1590_vm13, %v2198_v46, %v1587_v53  ;;  %v1594_v57 = vmul.f32 %v2200_v52, %v1593_v54 }
 0xa3b   : > { %v1602_v58 = vmul.f32 %v1591_v56, %v1568_v34 }
 0xa3c   : > { %v1595_v59 = vmul.f32 0.5, %v1594_v57 }
 0xa3d   : > { %v1607_v60 = vmul.f32 %v2157_v55, %v1602_v58 }
 0xa3e   : > { %v1596_v61 = vsub.f32 1.5, %v1595_v59 }
 0xa3f   : > { %v1612_v62 = vadd.f32 %v2158_v32, %v1607_v60 }
 0xa40   : > { %v1597_v63 = vmul.f32 %v2200_v52, %v1596_v61 }
 0xa41   : > { %1614 = vst.msk [vmem:[#allocation2] sm:$0xff] %vm818_vm0, %v1612_v62 }
 0xa42   : > { %v1601_v0 = vsel %vm1600_vm1, %v2200_v52, %v1597_v63 }
 0xa43   : > { %v1603_v1 = vmul.f32 %v1601_v0, %v1569_v38 }
 0xa45   : > { %v1608_v2 = vmul.f32 %v2157_v55, %v1603_v1  ;;  %1619 = sbr.rel (%p2025_p3) target bundleno = 2949 (0xb85), region = 123 }
 0xa47   : > { %v1613_v3 = vadd.f32 %v2158_v32, %v1608_v2 }
 0xa49   : > { %1615 = vst.msk [vmem:[#allocation2 + $0x8] sm:$0xff] %vm818_vm0, %v1613_v3 }
 0xa4a   : > { %v2062_v13 = vld [vmem:[#allocation9 + $0x8] sm:$0xff]  ;;  %v1620_v4 = vsel %vm818_vm0, %v1612_v62, 0.0  ;;  %v1627_v7 = vsel %vm818_vm0, %v1613_v3, 0.0  ;;  %v2376_v10 = vmov 8.0   ;;  %v2061_v11 = vld [vmem:[#allocation9] sm:$0xff]  ;;  %vm1657_vm3 = vcmask 1041409  }
 0xa4b   : > { %v1621_v8 = vrot.slane %v1620_v4, 4  ;;  %v1628_v9 = vrot.slane %v1627_v7, 4  ;;  %2203 = vrcp.f32 %v2376_v10  ;;  %1681 = vmatpush.bf16.msra.mxu0 %v2062_v13  ;;  %v2064_v36 = vld [vmem:[%s2898_s12 + $0x8] sm:$0xff]  ;;  %v2063_v37 = vld [vmem:[%s2898_s12] sm:$0xff]  ;;  %v2202_v44 = vld [vmem:[#allocation4] ss:$0 sm:$0xff] }
 0xa4c   : > { %1719 = vmatpush.bf16.msra.mxu1 %v2064_v36  ;;  %v2201_v38 = vld [vmem:[%s2899_s15] ss:$0 sm:$0xff]  ;;  %vm1745_vm6 = vcmask 1024  }
 0xa4d   : > { %v1622_v12 = vadd.f32 %v1621_v8, %v1620_v4  ;;  %v1629_v14 = vadd.f32 %v1628_v9, %v1627_v7 }
 0xa4f   : > { %v1623_v15 = vrot.slane %v1622_v12, 2  ;;  %v1630_v16 = vrot.slane %v1629_v14, 2  ;;  %1682 = vmatpush.bf16.msra.mxu0 %v2061_v11 }
 0xa50   : > { %1720 = vmatpush.bf16.msra.mxu1 %v2063_v37 }
 0xa51   : > { %v2204_v17 = vpop.eup %2203  ;;  %v1624_v19 = vadd.f32 %v1623_v15, %v1622_v12  ;;  %v1631_v20 = vadd.f32 %v1630_v16, %v1629_v14 }
 0xa52   : > { %v1635_v21 = vmul.f32 8.0, %v2204_v17  ;;  %vm1639_vm2 = vweird.f32 %v2204_v17 }
 0xa53   : > { %v1625_v22 = vrot.slane %v1624_v19, 1  ;;  %v1632_v23 = vrot.slane %v1631_v20, 1 }
 0xa54   : > { %v1636_v24 = vsub.f32 1.0, %v1635_v21 }
 0xa55   : > { %v1626_v26 = vadd.f32 %v1625_v22, %v1624_v19  ;;  %v1633_v18 = vadd.f32 %v1632_v23, %v1631_v20 }
 0xa56   : > { %v1637_v25 = vmul.f32 %v2204_v17, %v1636_v24 }
 0xa58   : > { %v1638_v27 = vadd.f32 %v2204_v17, %v1637_v25 }
 0xa5a   : > { %v1640_v28 = vsel %vm1639_vm2, %v2204_v17, %v1638_v27 }
 0xa5b   : > { %v1641_v29 = vmul.f32 %v1640_v28, %v1626_v26  ;;  %v1642_v30 = vmul.f32 %v1640_v28, %v1633_v18 }
 0xa5d   : > { %v1643_v31 = vpack.c.bf16 %v1641_v29, %v1641_v29  ;;  %v1644_v5 = vpack.c.bf16 %v1642_v30, %v1642_v30 }
 0xa5f   : > { %v1655_v33 = vunpack.c.l.b16 %v1643_v31  ;;  %v1656_v34 = vunpack.c.l.b16 %v1644_v5 }
 0xa61   : > { %v1658_v35 = vsel %vm1657_vm3, %v1656_v34, %v1655_v33 }
 0xa62   : > { %v1659_v6 = vpack.c.b16 %v1658_v35, %v1658_v35 }
 0xa64   : > { %2034 = vmatmul.msk.bf16.vlgmr.msra.gmra.mxu0 %vm818_vm0, %v1659_v6 }
 0xae1   : > { %v1684_v39 = vpop.f32.mrf.mxu0 }
 0xae2   : > { %v1685_v40 = vadd.f32 %v2201_v38, %v1684_v39 }
 0xae4   : > { %v1688_v41 = vmax.f32 %v1685_v40, 0.0 }
 0xae6   : > { %v1689_v42 = vpack.c.bf16 %v1688_v41, %v1688_v41 }
 0xae8   : > { %2043 = vmatmul.msk.bf16.vlgmr.msra.gmra.mxu1 %vm818_vm0, %v1689_v42 }
 0xae9   : > { %v1686_v43 = vpop.f32.mrf.mxu0 }
 0xb65   : > { %v1722_v45 = vpop.f32.mrf.mxu1 }
 0xb66   : > { %v1723_v46 = vadd.f32 %v2202_v44, %v1722_v45 }
 0xb68   : > { %v2044_v47 = vmul.f32 -1.442695, %v1723_v46 }
 0xb6a   : > { %2205 = vpow2.f32 %v2044_v47 }
 0xb6d   : > { %v1724_v48 = vpop.f32.mrf.mxu1 }
 0xb70   : > { %v2206_v49 = vpop.eup %2205 }
 0xb71   : > { %v1729_v50 = vadd.f32 1.0, %v2206_v49 }
 0xb73   : > { %2207 = vrcp.f32 %v1729_v50  ;;  %v1741_v54 = vand.u32 2147483648, %v1729_v50  ;;  %v1739_v56 = vand.u32 2147483647, %v1729_v50  ;;  %vm1735_vm5 = vweird.f32 %v1729_v50 }
 0xb75   : > { %v1742_v32 = vor.u32 1.1754944e-38, %v1741_v54  ;;  %vm1740_vm7 = vcmp.eq.f32.partialorder %v1739_v56, 8.507059e+37 }
 0xb79   : > { %v2208_v51 = vpop.eup %2207 }
 0xb7a   : > { %v1731_v52 = vmul.f32 %v2208_v51, %v1729_v50  ;;  %vm1736_vm4 = vweird.f32 %v2208_v51 }
 0xb7b   : > { %vm1737_vm0 = vmor %vm1735_vm5, %vm1736_vm4 }
 0xb7c   : > { %v1732_v53 = vsub.f32 1.0, %v1731_v52 }
 0xb7e   : > { %v1733_v55 = vmul.f32 %v2208_v51, %v1732_v53 }
 0xb80   : > { %v1734_v57 = vadd.f32 %v2208_v51, %v1733_v55 }
 0xb82   : > { %v1738_v58 = vsel %vm1737_vm0, %v2208_v51, %v1734_v57 }
 0xb83   : > { %v1743_v59 = vsel %vm1740_vm7, %v1742_v32, %v1738_v58 }
 0xb84   : > { %1746 = vst.msk [vmem:[%s2900_s9] sm:$0x3] %vm1745_vm6, %v1743_v59 }
 0xb85 PF: > { %s35_s30 = sadd.s32 1, %s2359_s30   ;;  %s2901_s14 = sld [smem:[#allocation15_spill]] }
 0xb86   : > { %p32_p4 = scmp.ge.s32.totalorder %s35_s30, 4   ;;  %s2902_s28 = sld [smem:[#allocation18_spill]] }
 0xb87   : > { %s2903_s29 = sld [smem:[#allocation16_spill]]  ;;  %s2905_s26 = smov %s2343_s27 }
 0xb88   : > { %s2904_s0 = sld [smem:[#allocation17_spill]]  ;;  %34 = sbr.rel (!%p32_p4) target bundleno = 22 (0x16), region = 203 }
 0xb8b   : > { %s2906_s27 = smov %s2901_s14 }
 0xb8d   :  { %1766 = vsyncpa [#allocation6], 1 }
 0xb8e   :  { %1768 = vsyncpa [#allocation6 + $0x1], 1 }
 0xb8f   :  { %1769 = vsyncpa [#allocation8], 1 }
 0xb90   :  { %1771 = vsyncpa [#allocation8 + $0x1], 1 }
 0xb91   :  { %1772 = vsyncmov [#allocation3] }
 0xb94   :  { %s1773_s2 = vpop.sfrf %1772 }
 0xb95   :  { %p2048_p5 = scmp.ne.s32.totalorder %s1773_s2, 0 }
 0xb97   :  { %1777 = shalt.err (%p2048_p5)  }

</bundles_post_ra>
